<compile_context>
chip_gen: v7x
topology: tpu7x:2x2x1
jax: 0.10.0
libtpu: 0.0.40
codegen_flags: <defaults>
</compile_context>

<pallas_src>
import inspect

import jax
import jax.numpy as jnp
from jax import lax
from jax.experimental import pallas as pl
from jax.experimental.pallas import tpu as pltpu


# ---------------------------------------------------------------------------
# Kernel
# ---------------------------------------------------------------------------
def butd_attend_kernel(fea_ref, hid_ref, wf_ref, wh_ref, wa_ref, bfh_ref,
                       wfea_ref, weight_ref):
    """One batch tile of the BUTD attention forward.

    fea_ref:  (TB, N, F) f32/bf16   wf_ref:  (F, A) bf16
    hid_ref:  (TB, H)    f32/bf16   wh_ref:  (H, A) bf16
    wa_ref:   (1, A)     f32        bfh_ref: (1, A) f32   (= bf + bh, pre-folded)
    wfea_ref: (TB, F)               weight_ref: (TB, N) f32
    A is the lane-padded attention dim (zero columns are exact no-ops).
    """
    fea = fea_ref[...]                                   # (TB, N, F): read once, used twice
    tb, n, f = fea.shape
    a = wf_ref.shape[1]

    x = fea.astype(jnp.bfloat16)
    if n % 8 == 0:
        # (TB*N, F) is sublane-aligned -> reshape is a free view; plain 2-D MXU matmul.
        att1 = jnp.dot(x.reshape(tb * n, f), wf_ref[...],
                       preferred_element_type=jnp.float32).reshape(tb, n, a)
    else:
        # N % 8 != 0 (e.g. BUTD's N=36): merging batch into the sublane axis would force
        # a full (TB,N,F) relayout copy each step; keep the batch dim and do a 3-D dot.
        att1 = lax.dot_general(x, wf_ref[...], (((2,), (0,)), ((), ())),
                               preferred_element_type=jnp.float32)          # (TB, N, A)

    # hid_att: Linear(hid_dim -> att_dim); bf folded into bh -> single (1, A) bias add.
    att2 = jnp.dot(hid_ref[...].astype(jnp.bfloat16), wh_ref[...],
                   preferred_element_type=jnp.float32) + bfh_ref[...]       # (TB, A)

    # relu(att1 + att2.unsqueeze(1)) in f32.
    act = jnp.maximum(att1 + att2[:, None, :], 0.0)                         # (TB, N, A)
    # TODO(synk): nn.Dropout(p=0.5) treated as eval-mode identity (train-mode RNG not reproduced).

    # att_weight: Linear(att_dim -> 1).  The scalar bias `ba` cancels in the softmax and
    # `att` is never returned, so it is dropped.  keepdims keeps the region axis on the
    # sublane axis so the (TB, N, 1) weights feed the weighted sum with no relayout.
    att = jnp.sum(act * wa_ref[...], axis=-1, keepdims=True)                # (TB, N, 1)

    # Softmax over the region axis; exact division so the returned (user-visible)
    # weights sum to 1 up to f32 rounding.
    m = jnp.max(att, axis=1, keepdims=True)                                 # (TB, 1, 1)
    e = jnp.exp(att - m)
    w = e / jnp.sum(e, axis=1, keepdims=True)                               # (TB, N, 1)

    # Weighted sum of the already-VMEM-resident fea tile, f32 accumulation.
    wfea_ref[...] = jnp.sum(fea.astype(jnp.float32) * w, axis=1).astype(wfea_ref.dtype)
    weight_ref[...] = w[:, :, 0]                                            # single squeeze


# ---------------------------------------------------------------------------
# Tiling / VMEM heuristics (generation-aware)
# ---------------------------------------------------------------------------
def _round_up(x, m):
    return ((x + m - 1) // m) * m


def _vmem_capacity_bytes():
    """Physical VMEM per TensorCore (v5e/v6e: 128 MiB, v7x: 64 MiB)."""
    try:
        return int(pltpu.get_tpu_info().vmem_capacity_bytes)
    except Exception:
        return 64 * 1024 * 1024          # conservative fallback = v7x per-core VMEM


def _tile_footprint_bytes(tb, n, f, h, a_pad, fea_itemsize):
    """Approximate per-grid-step VMEM footprint (pipeline buffers + live temporaries)."""
    n_pad = _round_up(n, 8)
    fea_in = 2 * tb * n_pad * f * fea_itemsize                 # double-buffered fea tile
    fea_f32 = tb * n_pad * f * 4                               # f32 value for weighted sum
    fea_bf16 = tb * n_pad * f * 2 if fea_itemsize == 4 else 0  # bf16 MXU operand copy
    hid_in = 2 * tb * _round_up(h, 128) * fea_itemsize         # double-buffered hidden tile
    act_live = 2 * tb * n_pad * a_pad * 4                      # att1 and act live together
    out_buf = 2 * tb * (_round_up(f, 128) + 128) * 4           # double-buffered outputs
    softmax = 2 * tb * n_pad * 128 * 4                         # keepdims (TB,N,1) temporaries
    return fea_in + fea_f32 + fea_bf16 + hid_in + act_live + out_buf + softmax


def _auto_batch_tile(b, n, f, h, a_pad, fea_itemsize, budget):
    """Largest sublane-legal batch tile whose pipelined footprint fits `budget`,
    capped so the grid has >= 2 steps when the batch allows it (the 'parallel'
    axis only shards across v7x's two TensorCores with >= 2 grid steps)."""
    if b <= 8:
        return b
    tb = _round_up(-(-b // 2), 8)                              # ceil(b/2), 8-aligned (< b)
    while tb > 8 and _tile_footprint_bytes(tb, n, f, h, a_pad, fea_itemsize) > budget:
        tb -= 8
    return tb


def _supports_pipeline_mode():
    if not hasattr(pl, "Buffered"):
        return False
    try:
        return "pipeline_mode" in inspect.signature(pl.BlockSpec).parameters
    except (TypeError, ValueError):
        return False


def _resident_spec(shape, single_buffer):
    """Grid-invariant (weight) input: constant index_map keeps it VMEM-resident;
    Buffered(1) drops the default 2nd pipeline buffer (VMEM matters on v7x's 64 MiB)."""
    index_map = lambda i: (0,) * len(shape)
    if single_buffer:
        return pl.BlockSpec(shape, index_map, pipeline_mode=pl.Buffered(1))
    return pl.BlockSpec(shape, index_map)


def _pad_lanes(x, target):
    pad = target - x.shape[-1]
    if pad == 0:
        return x
    return jnp.pad(x, ((0, 0), (0, pad)))


# ---------------------------------------------------------------------------
# Wrapper
# ---------------------------------------------------------------------------
def butd_attend(fea_maps, hidden, Wf, bf, Wh, bh, Wa, ba, *, tb=None):
    """fea_maps: (B, N, F) f32 or bf16 (passed through unchanged -> no extra HBM pass),
    hidden: (B, H).  Weights in PyTorch layout: Wf (A, F), bf (A,), Wh (A, H), bh (A,),
    Wa (1, A), ba (1,)."""
    b, n, f = fea_maps.shape
    h = hidden.shape[1]
    a = Wf.shape[0]
    a_pad = _round_up(a, 128)

    # Plain-JAX parameter glue (once per call, negligible): transpose to (in, out),
    # cast MXU weights to bf16, lane-pad A to a multiple of 128 (zero columns are exact
    # no-ops through relu and the wa reduction), fold bf into bh, drop ba (cancels).
    wf_t = _pad_lanes(Wf.T, a_pad).astype(jnp.bfloat16)               # (F, A_pad)
    wh_t = _pad_lanes(Wh.T, a_pad).astype(jnp.bfloat16)               # (H, A_pad)
    wa_row = _pad_lanes(Wa.reshape(1, a), a_pad).astype(jnp.float32)  # (1, A_pad)
    bfh = _pad_lanes((bf + bh).reshape(1, a), a_pad).astype(jnp.float32)
    del ba  # constant shift along the softmax axis: exactly cancels in the outputs.

    fea_itemsize = fea_maps.dtype.itemsize
    vmem_cap = _vmem_capacity_bytes()
    vmem_limit = int((vmem_cap * 3) // 4)     # 96 MiB on v5e/v6e (128 MiB), 48 MiB on v7x (64 MiB)
    weight_bytes = 2 * ((f + h) * a_pad * 2 + 2 * a_pad * 4)          # resident weights (cons.)
    budget = max(vmem_limit - weight_bytes - (2 << 20), 4 << 20)      # headroom for Mosaic scratch

    if tb is None:
        tb = _auto_batch_tile(b, n, f, h, a_pad, fea_itemsize, budget)
    grid = (pl.cdiv(b, tb),)
    # NOTE: when b % tb != 0 the padded rows of the last step run exp on unspecified
    # data; valid output rows are unaffected (row-wise independent softmax).

    cost = pl.CostEstimate(
        flops=2 * b * n * f * a_pad + 2 * b * h * a_pad + 2 * b * n * a_pad + 2 * b * n * f,
        transcendentals=b * n,
        bytes_accessed=(b * n * f * fea_itemsize + b * h * hidden.dtype.itemsize
                        + 2 * (f + h) * a_pad + 8 * a_pad
                        + b * f * fea_itemsize + 4 * b * n),
    )

    out_shape = (jax.ShapeDtypeStruct((b, f), fea_maps.dtype),
                 jax.ShapeDtypeStruct((b, n), jnp.float32))

    data_specs = [
        pl.BlockSpec((tb, n, f), lambda i: (i, 0, 0)),   # fea tile (double-buffered)
        pl.BlockSpec((tb, h), lambda i: (i, 0)),         # hidden tile
    ]
    out_specs = (
        pl.BlockSpec((tb, f), lambda i: (i, 0)),
        # TODO(synk): (B, N) weight output is lane-sparse (N << 128); pad to 128 lanes and
        # slice outside only if the consumer permits (module API returns (B, N)).
        pl.BlockSpec((tb, n), lambda i: (i, 0)),
    )
    compiler_params = pltpu.CompilerParams(
        dimension_semantics=("parallel",),               # megacore sharding (grid >= 2 steps)
        vmem_limit_bytes=vmem_limit,
    )

    def run(single_buffer_weights):
        weight_specs = [
            _resident_spec((f, a_pad), single_buffer_weights),   # Wf
            _resident_spec((h, a_pad), single_buffer_weights),   # Wh
            _resident_spec((1, a_pad), single_buffer_weights),   # Wa row
            _resident_spec((1, a_pad), single_buffer_weights),   # bf + bh
        ]
        return pl.pallas_call(
            butd_attend_kernel,
            out_shape=out_shape,
            grid=grid,
            in_specs=data_specs + weight_specs,
            out_specs=out_specs,
            compiler_params=compiler_params,
            cost_estimate=cost,
        )(fea_maps, hidden, wf_t, wh_t, wa_row, bfh)

    if _supports_pipeline_mode():
        try:
            return run(True)
        except Exception:   # Buffered(1) not accepted by this lowering -> default buffering
            pass
    return run(False)


# ---------------------------------------------------------------------------
# Parameter init + pure-JAX reference (PyTorch-equivalent forward)
# ---------------------------------------------------------------------------
def weight_norm_param(key, out_dim, in_dim):
    """Deterministic init of a weight-norm'd Linear: W = g * v / ||v|| (dim=0)."""
    kv, kg, kb = jax.random.split(key, 3)
    v = jax.random.normal(kv, (out_dim, in_dim), jnp.float32) * 0.1
    g = 1.0 + 0.1 * jax.random.normal(kg, (out_dim, 1), jnp.float32)
    w = g * v / jnp.linalg.norm(v, axis=1, keepdims=True)
    b = 0.05 * jax.random.normal(kb, (out_dim,), jnp.float32)
    return w, b


def reference_forward(fea, hid, Wf, bf, Wh, bh, Wa, ba, matmul_dtype=jnp.float32):
    """Pure-JAX reference matching the PyTorch forward (dropout in eval mode).
    matmul_dtype=bfloat16 mirrors the kernel's MXU precision (f32 accumulation)."""
    att1 = jnp.dot(fea.astype(matmul_dtype), Wf.T.astype(matmul_dtype),
                   preferred_element_type=jnp.float32) + bf           # (B, N, A)
    att2 = jnp.dot(hid.astype(matmul_dtype), Wh.T.astype(matmul_dtype),
                   preferred_element_type=jnp.float32) + bh           # (B, A)
    act = jnp.maximum(att1 + att2[:, None, :], 0.0)
    att = (act @ Wa.T + ba)[..., 0]                                   # (B, N)
    w = jax.nn.softmax(att, axis=1)
    weighted = (fea * w[:, :, None]).sum(axis=1)                      # (B, F)
    return weighted, w


if __name__ == "__main__":
    # Small shapes consistent with the module: (batch, regions, fea_dim), (batch, hid_dim).
    B, N, FEA, HID, ATT = 16, 8, 32, 32, 32

    key = jax.random.PRNGKey(0)
    k_fea, k_hid, k_wf, k_wh, k_wa = jax.random.split(key, 5)

    fea_maps = jax.random.normal(k_fea, (B, N, FEA), jnp.float32)
    hidden = jax.random.normal(k_hid, (B, HID), jnp.float32)

    Wf, bf = weight_norm_param(k_wf, ATT, FEA)   # fea_att
    Wh, bh = weight_norm_param(k_wh, ATT, HID)   # hid_att
    Wa, ba = weight_norm_param(k_wa, 1, ATT)     # att_weight

    # Auto tile -> tb=8, grid=(2,): exercises the batch-tiled double-buffered pipeline
    # and keeps >= 2 grid steps so the 'parallel' axis can shard across TensorCores.
    wfea_out, weight_out = butd_attend(fea_maps, hidden, Wf, bf, Wh, bh, Wa, ba)
    jax.block_until_ready((wfea_out, weight_out))

    # Precision-matched reference (bf16 matmuls, f32 accumulation): tight tolerance.
    ref_wfea_bf, ref_weight_bf = reference_forward(
        fea_maps, hidden, Wf, bf, Wh, bh, Wa, ba, matmul_dtype=jnp.bfloat16)
    assert jnp.allclose(weight_out, ref_weight_bf, rtol=1e-2, atol=1e-2)
    assert jnp.allclose(wfea_out, ref_wfea_bf, rtol=1e-2, atol=1e-2)

    # Full-f32 reference (PyTorch-equivalent): loose sanity check (bf16 MXU path).
    ref_wfea, ref_weight = reference_forward(fea_maps, hidden, Wf, bf, Wh, bh, Wa, ba)
    assert jnp.allclose(weight_out, ref_weight, rtol=1e-1, atol=1e-1)
    assert jnp.allclose(wfea_out, ref_wfea, rtol=1e-1, atol=1e-1)

    # Exact softmax division: rows sum to 1 up to f32 rounding.
    assert jnp.allclose(weight_out.sum(axis=1), 1.0, atol=1e-5)

    print("KERNEL_OK")
</pallas_src>

<mosaic_0001>
module attributes {stable_mosaic.version = 11 : i64} {
  func.func @butd_attend_kernel(%arg0: i32, %arg1: memref<8x8x32xf32, #tpu.memory_space<vmem>>, %arg2: memref<8x32xf32, #tpu.memory_space<vmem>>, %arg3: memref<32x128xbf16, #tpu.memory_space<vmem>>, %arg4: memref<32x128xbf16, #tpu.memory_space<vmem>>, %arg5: memref<1x128xf32, #tpu.memory_space<vmem>>, %arg6: memref<1x128xf32, #tpu.memory_space<vmem>>, %arg7: memref<8x32xf32, #tpu.memory_space<vmem>>, %arg8: memref<8x8xf32, #tpu.memory_space<vmem>>) attributes {dimension_semantics = [#tpu.dimension_semantics<parallel>], iteration_bounds = array<i64: 2>, scalar_prefetch = 0 : i64, scratch_operands = 0 : i64, tpu.core_type = #tpu.core_type<tc>, window_params = [{transform_indices = @transform_0, window_bounds = array<i64: 8, 8, 32>}, {transform_indices = @transform_1, window_bounds = array<i64: 8, 32>}, {pipeline_mode = #tpu.pipeline_mode<synchronous>, transform_indices = @transform_2, window_bounds = array<i64: 32, 128>}, {pipeline_mode = #tpu.pipeline_mode<synchronous>, transform_indices = @transform_3, window_bounds = array<i64: 32, 128>}, {pipeline_mode = #tpu.pipeline_mode<synchronous>, transform_indices = @transform_4, window_bounds = array<i64: 1, 128>}, {pipeline_mode = #tpu.pipeline_mode<synchronous>, transform_indices = @transform_5, window_bounds = array<i64: 1, 128>}, {transform_indices = @transform_6, window_bounds = array<i64: 8, 32>}, {transform_indices = @transform_7, window_bounds = array<i64: 8, 8>}]} {
    %c0 = arith.constant 0 : index
    %c0_0 = arith.constant 0 : index
    %c0_1 = arith.constant 0 : index
    %0 = vector.load %arg1[%c0, %c0_0, %c0_1] : memref<8x8x32xf32, #tpu.memory_space<vmem>>, vector<8x8x32xf32>
    %1 = arith.truncf %0 : vector<8x8x32xf32> to vector<8x8x32xbf16>
    %2 = vector.shape_cast %1 : vector<8x8x32xbf16> to vector<64x32xbf16>
    %c0_2 = arith.constant 0 : index
    %c0_3 = arith.constant 0 : index
    %3 = vector.load %arg3[%c0_2, %c0_3] : memref<32x128xbf16, #tpu.memory_space<vmem>>, vector<32x128xbf16>
    %cst = arith.constant dense<0.000000e+00> : vector<64x128xf32>
    %4 = tpu.matmul %2, %3, %cst {dimension_numbers = #tpu.dot_dimension_numbers<[1], [0], [0], [1], [0, 0, 1, 1], [], []>} : vector<64x32xbf16>, vector<32x128xbf16>, vector<64x128xf32> -> vector<64x128xf32>
    %5 = vector.shape_cast %4 : vector<64x128xf32> to vector<8x8x128xf32>
    %c0_4 = arith.constant 0 : index
    %c0_5 = arith.constant 0 : index
    %6 = vector.load %arg2[%c0_4, %c0_5] : memref<8x32xf32, #tpu.memory_space<vmem>>, vector<8x32xf32>
    %7 = arith.truncf %6 : vector<8x32xf32> to vector<8x32xbf16>
    %c0_6 = arith.constant 0 : index
    %c0_7 = arith.constant 0 : index
    %8 = vector.load %arg4[%c0_6, %c0_7] : memref<32x128xbf16, #tpu.memory_space<vmem>>, vector<32x128xbf16>
    %cst_8 = arith.constant dense<0.000000e+00> : vector<8x128xf32>
    %9 = tpu.matmul %7, %8, %cst_8 {dimension_numbers = #tpu.dot_dimension_numbers<[1], [0], [0], [1], [0, 0, 1, 1], [], []>} : vector<8x32xbf16>, vector<32x128xbf16>, vector<8x128xf32> -> vector<8x128xf32>
    %c0_9 = arith.constant 0 : index
    %c0_10 = arith.constant 0 : index
    %10 = vector.load %arg6[%c0_9, %c0_10] : memref<1x128xf32, #tpu.memory_space<vmem>>, vector<1x128xf32>
    %11 = vector.broadcast %10 : vector<1x128xf32> to vector<8x128xf32>
    %12 = arith.addf %9, %11 : vector<8x128xf32>
    %13 = vector.shape_cast %12 : vector<8x128xf32> to vector<8x1x128xf32>
    %14 = vector.broadcast %13 : vector<8x1x128xf32> to vector<8x8x128xf32>
    %15 = arith.addf %5, %14 : vector<8x8x128xf32>
    %cst_11 = arith.constant 0.000000e+00 : f32
    %16 = vector.broadcast %cst_11 : f32 to vector<8x8x128xf32>
    %17 = arith.maximumf %15, %16 : vector<8x8x128xf32>
    %c0_12 = arith.constant 0 : index
    %c0_13 = arith.constant 0 : index
    %18 = vector.load %arg5[%c0_12, %c0_13] : memref<1x128xf32, #tpu.memory_space<vmem>>, vector<1x128xf32>
    %19 = vector.shape_cast %18 : vector<1x128xf32> to vector<1x1x128xf32>
    %20 = vector.broadcast %19 : vector<1x1x128xf32> to vector<8x8x128xf32>
    %21 = arith.mulf %17, %20 : vector<8x8x128xf32>
    %cst_14 = arith.constant dense<0.000000e+00> : vector<8x8xf32>
    %22 = vector.multi_reduction <add>, %21, %cst_14 [2] : vector<8x8x128xf32> to vector<8x8xf32>
    %23 = vector.shape_cast %22 : vector<8x8xf32> to vector<8x8x1xf32>
    %cst_15 = arith.constant dense<0xFF800000> : vector<8x1xf32>
    %24 = vector.multi_reduction <maximumf>, %23, %cst_15 [1] : vector<8x8x1xf32> to vector<8x1xf32>
    %25 = vector.shape_cast %24 : vector<8x1xf32> to vector<8x1x1xf32>
    %26 = vector.broadcast %25 : vector<8x1x1xf32> to vector<8x8x1xf32>
    %27 = arith.subf %23, %26 : vector<8x8x1xf32>
    %28 = math.exp %27 : vector<8x8x1xf32>
    %cst_16 = arith.constant dense<0.000000e+00> : vector<8x1xf32>
    %29 = vector.multi_reduction <add>, %28, %cst_16 [1] : vector<8x8x1xf32> to vector<8x1xf32>
    %30 = vector.shape_cast %29 : vector<8x1xf32> to vector<8x1x1xf32>
    %31 = vector.broadcast %30 : vector<8x1x1xf32> to vector<8x8x1xf32>
    %32 = arith.divf %28, %31 : vector<8x8x1xf32>
    %33 = vector.broadcast %32 : vector<8x8x1xf32> to vector<8x8x32xf32>
    %34 = arith.mulf %0, %33 : vector<8x8x32xf32>
    %cst_17 = arith.constant dense<0.000000e+00> : vector<8x32xf32>
    %35 = vector.multi_reduction <add>, %34, %cst_17 [1] : vector<8x8x32xf32> to vector<8x32xf32>
    %c0_18 = arith.constant 0 : index
    %c0_19 = arith.constant 0 : index
    %36 = vector.load %arg7[%c0_18, %c0_19] : memref<8x32xf32, #tpu.memory_space<vmem>>, vector<8x32xf32>
    tpu.vector_store %arg7[%c0_18, %c0_19], %35 {strides = array<i32>} : memref<8x32xf32, #tpu.memory_space<vmem>>, vector<8x32xf32>,
    %37 = vector.shape_cast %32 : vector<8x8x1xf32> to vector<8x8xf32>
    %c0_20 = arith.constant 0 : index
    %c0_21 = arith.constant 0 : index
    %38 = vector.load %arg8[%c0_20, %c0_21] : memref<8x8xf32, #tpu.memory_space<vmem>>, vector<8x8xf32>
    tpu.vector_store %arg8[%c0_20, %c0_21], %37 {strides = array<i32>} : memref<8x8xf32, #tpu.memory_space<vmem>>, vector<8x8xf32>,
    return
  }
  func.func @transform_0(%arg0: i32) -> (i32, i32, i32) {
    %c0_i32 = arith.constant 0 : i32
    %c0_i32_0 = arith.constant 0 : i32
    %c0_i32_1 = arith.constant 0 : i32
    return %arg0, %c0_i32, %c0_i32_0 : i32, i32, i32
  }
  func.func @transform_1(%arg0: i32) -> (i32, i32) {
    %c0_i32 = arith.constant 0 : i32
    %c0_i32_0 = arith.constant 0 : i32
    return %arg0, %c0_i32 : i32, i32
  }
  func.func @transform_2(%arg0: i32) -> (i32, i32) {
    %c0_i32 = arith.constant 0 : i32
    %c0_i32_0 = arith.constant 0 : i32
    %c0_i32_1 = arith.constant 0 : i32
    return %c0_i32, %c0_i32_0 : i32, i32
  }
  func.func @transform_3(%arg0: i32) -> (i32, i32) {
    %c0_i32 = arith.constant 0 : i32
    %c0_i32_0 = arith.constant 0 : i32
    %c0_i32_1 = arith.constant 0 : i32
    return %c0_i32, %c0_i32_0 : i32, i32
  }
  func.func @transform_4(%arg0: i32) -> (i32, i32) {
    %c0_i32 = arith.constant 0 : i32
    %c0_i32_0 = arith.constant 0 : i32
    %c0_i32_1 = arith.constant 0 : i32
    return %c0_i32, %c0_i32_0 : i32, i32
  }
  func.func @transform_5(%arg0: i32) -> (i32, i32) {
    %c0_i32 = arith.constant 0 : i32
    %c0_i32_0 = arith.constant 0 : i32
    %c0_i32_1 = arith.constant 0 : i32
    return %c0_i32, %c0_i32_0 : i32, i32
  }
  func.func @transform_6(%arg0: i32) -> (i32, i32) {
    %c0_i32 = arith.constant 0 : i32
    %c0_i32_0 = arith.constant 0 : i32
    return %arg0, %c0_i32 : i32, i32
  }
  func.func @transform_7(%arg0: i32) -> (i32, i32) {
    %c0_i32 = arith.constant 0 : i32
    %c0_i32_0 = arith.constant 0 : i32
    return %arg0, %c0_i32 : i32, i32
  }
}

module attributes {stable_mosaic.version = 11 : i64} {
  func.func @butd_attend_kernel(%arg0: i32, %arg1: memref<8x8x32xf32, #tpu.memory_space<vmem>>, %arg2: memref<8x32xf32, #tpu.memory_space<vmem>>, %arg3: memref<32x128xbf16, #tpu.memory_space<vmem>>, %arg4: memref<32x128xbf16, #tpu.memory_space<vmem>>, %arg5: memref<1x128xf32, #tpu.memory_space<vmem>>, %arg6: memref<1x128xf32, #tpu.memory_space<vmem>>, %arg7: memref<8x32xf32, #tpu.memory_space<vmem>>, %arg8: memref<8x8xf32, #tpu.memory_space<vmem>>) attributes {dimension_semantics = [#tpu.dimension_semantics<parallel>], iteration_bounds = array<i64: 2>, scalar_prefetch = 0 : i64, scratch_operands = 0 : i64, tpu.core_type = #tpu.core_type<tc>, window_params = [{transform_indices = @transform_0, window_bounds = array<i64: 8, 8, 32>}, {transform_indices = @transform_1, window_bounds = array<i64: 8, 32>}, {pipeline_mode = #tpu.pipeline_mode<synchronous>, transform_indices = @transform_2, window_bounds = array<i64: 32, 128>}, {pipeline_mode = #tpu.pipeline_mode<synchronous>, transform_indices = @transform_3, window_bounds = array<i64: 32, 128>}, {pipeline_mode = #tpu.pipeline_mode<synchronous>, transform_indices = @transform_4, window_bounds = array<i64: 1, 128>}, {pipeline_mode = #tpu.pipeline_mode<synchronous>, transform_indices = @transform_5, window_bounds = array<i64: 1, 128>}, {transform_indices = @transform_6, window_bounds = array<i64: 8, 32>}, {transform_indices = @transform_7, window_bounds = array<i64: 8, 8>}]} {
    %c0 = arith.constant 0 : index
    %c0_0 = arith.constant 0 : index
    %c0_1 = arith.constant 0 : index
    %0 = vector.load %arg1[%c0, %c0_0, %c0_1] : memref<8x8x32xf32, #tpu.memory_space<vmem>>, vector<8x8x32xf32>
    %1 = arith.truncf %0 : vector<8x8x32xf32> to vector<8x8x32xbf16>
    %2 = vector.shape_cast %1 : vector<8x8x32xbf16> to vector<64x32xbf16>
    %c0_2 = arith.constant 0 : index
    %c0_3 = arith.constant 0 : index
    %3 = vector.load %arg3[%c0_2, %c0_3] : memref<32x128xbf16, #tpu.memory_space<vmem>>, vector<32x128xbf16>
    %cst = arith.constant dense<0.000000e+00> : vector<64x128xf32>
    %4 = tpu.matmul %2, %3, %cst {dimension_numbers = #tpu.dot_dimension_numbers<[1], [0], [0], [1], [0, 0, 1, 1], [], []>} : vector<64x32xbf16>, vector<32x128xbf16>, vector<64x128xf32> -> vector<64x128xf32>
    %5 = vector.shape_cast %4 : vector<64x128xf32> to vector<8x8x128xf32>
    %c0_4 = arith.constant 0 : index
    %c0_5 = arith.constant 0 : index
    %6 = vector.load %arg2[%c0_4, %c0_5] : memref<8x32xf32, #tpu.memory_space<vmem>>, vector<8x32xf32>
    %7 = arith.truncf %6 : vector<8x32xf32> to vector<8x32xbf16>
    %c0_6 = arith.constant 0 : index
    %c0_7 = arith.constant 0 : index
    %8 = vector.load %arg4[%c0_6, %c0_7] : memref<32x128xbf16, #tpu.memory_space<vmem>>, vector<32x128xbf16>
    %cst_8 = arith.constant dense<0.000000e+00> : vector<8x128xf32>
    %9 = tpu.matmul %7, %8, %cst_8 {dimension_numbers = #tpu.dot_dimension_numbers<[1], [0], [0], [1], [0, 0, 1, 1], [], []>} : vector<8x32xbf16>, vector<32x128xbf16>, vector<8x128xf32> -> vector<8x128xf32>
    %c0_9 = arith.constant 0 : index
    %c0_10 = arith.constant 0 : index
    %10 = vector.load %arg6[%c0_9, %c0_10] : memref<1x128xf32, #tpu.memory_space<vmem>>, vector<1x128xf32>
    %11 = vector.broadcast %10 : vector<1x128xf32> to vector<8x128xf32>
    %12 = arith.addf %9, %11 : vector<8x128xf32>
    %13 = vector.shape_cast %12 : vector<8x128xf32> to vector<8x1x128xf32>
    %14 = vector.broadcast %13 : vector<8x1x128xf32> to vector<8x8x128xf32>
    %15 = arith.addf %5, %14 : vector<8x8x128xf32>
    %cst_11 = arith.constant 0.000000e+00 : f32
    %16 = vector.broadcast %cst_11 : f32 to vector<8x8x128xf32>
    %17 = arith.maximumf %15, %16 : vector<8x8x128xf32>
    %c0_12 = arith.constant 0 : index
    %c0_13 = arith.constant 0 : index
    %18 = vector.load %arg5[%c0_12, %c0_13] : memref<1x128xf32, #tpu.memory_space<vmem>>, vector<1x128xf32>
    %19 = vector.shape_cast %18 : vector<1x128xf32> to vector<1x1x128xf32>
    %20 = vector.broadcast %19 : vector<1x1x128xf32> to vector<8x8x128xf32>
    %21 = arith.mulf %17, %20 : vector<8x8x128xf32>
    %cst_14 = arith.constant dense<0.000000e+00> : vector<8x8xf32>
    %22 = vector.multi_reduction <add>, %21, %cst_14 [2] : vector<8x8x128xf32> to vector<8x8xf32>
    %23 = vector.shape_cast %22 : vector<8x8xf32> to vector<8x8x1xf32>
    %cst_15 = arith.constant dense<0xFF800000> : vector<8x1xf32>
    %24 = vector.multi_reduction <maximumf>, %23, %cst_15 [1] : vector<8x8x1xf32> to vector<8x1xf32>
    %25 = vector.shape_cast %24 : vector<8x1xf32> to vector<8x1x1xf32>
    %26 = vector.broadcast %25 : vector<8x1x1xf32> to vector<8x8x1xf32>
    %27 = arith.subf %23, %26 : vector<8x8x1xf32>
    %28 = math.exp %27 : vector<8x8x1xf32>
    %cst_16 = arith.constant dense<0.000000e+00> : vector<8x1xf32>
    %29 = vector.multi_reduction <add>, %28, %cst_16 [1] : vector<8x8x1xf32> to vector<8x1xf32>
    %30 = vector.shape_cast %29 : vector<8x1xf32> to vector<8x1x1xf32>
    %31 = vector.broadcast %30 : vector<8x1x1xf32> to vector<8x8x1xf32>
    %32 = arith.divf %28, %31 : vector<8x8x1xf32>
    %33 = vector.broadcast %32 : vector<8x8x1xf32> to vector<8x8x32xf32>
    %34 = arith.mulf %0, %33 : vector<8x8x32xf32>
    %cst_17 = arith.constant dense<0.000000e+00> : vector<8x32xf32>
    %35 = vector.multi_reduction <add>, %34, %cst_17 [1] : vector<8x8x32xf32> to vector<8x32xf32>
    %c0_18 = arith.constant 0 : index
    %c0_19 = arith.constant 0 : index
    %36 = vector.load %arg7[%c0_18, %c0_19] : memref<8x32xf32, #tpu.memory_space<vmem>>, vector<8x32xf32>
    tpu.vector_store %arg7[%c0_18, %c0_19], %35 {strides = array<i32>} : memref<8x32xf32, #tpu.memory_space<vmem>>, vector<8x32xf32>,
    %37 = vector.shape_cast %32 : vector<8x8x1xf32> to vector<8x8xf32>
    %c0_20 = arith.constant 0 : index
    %c0_21 = arith.constant 0 : index
    %38 = vector.load %arg8[%c0_20, %c0_21] : memref<8x8xf32, #tpu.memory_space<vmem>>, vector<8x8xf32>
    tpu.vector_store %arg8[%c0_20, %c0_21], %37 {strides = array<i32>} : memref<8x8xf32, #tpu.memory_space<vmem>>, vector<8x8xf32>,
    return
  }
  func.func @transform_0(%arg0: i32) -> (i32, i32, i32) {
    %c0_i32 = arith.constant 0 : i32
    %c0_i32_0 = arith.constant 0 : i32
    %c0_i32_1 = arith.constant 0 : i32
    return %arg0, %c0_i32, %c0_i32_0 : i32, i32, i32
  }
  func.func @transform_1(%arg0: i32) -> (i32, i32) {
    %c0_i32 = arith.constant 0 : i32
    %c0_i32_0 = arith.constant 0 : i32
    return %arg0, %c0_i32 : i32, i32
  }
  func.func @transform_2(%arg0: i32) -> (i32, i32) {
    %c0_i32 = arith.constant 0 : i32
    %c0_i32_0 = arith.constant 0 : i32
    %c0_i32_1 = arith.constant 0 : i32
    return %c0_i32, %c0_i32_0 : i32, i32
  }
  func.func @transform_3(%arg0: i32) -> (i32, i32) {
    %c0_i32 = arith.constant 0 : i32
    %c0_i32_0 = arith.constant 0 : i32
    %c0_i32_1 = arith.constant 0 : i32
    return %c0_i32, %c0_i32_0 : i32, i32
  }
  func.func @transform_4(%arg0: i32) -> (i32, i32) {
    %c0_i32 = arith.constant 0 : i32
    %c0_i32_0 = arith.constant 0 : i32
    %c0_i32_1 = arith.constant 0 : i32
    return %c0_i32, %c0_i32_0 : i32, i32
  }
  func.func @transform_5(%arg0: i32) -> (i32, i32) {
    %c0_i32 = arith.constant 0 : i32
    %c0_i32_0 = arith.constant 0 : i32
    %c0_i32_1 = arith.constant 0 : i32
    return %c0_i32, %c0_i32_0 : i32, i32
  }
  func.func @transform_6(%arg0: i32) -> (i32, i32) {
    %c0_i32 = arith.constant 0 : i32
    %c0_i32_0 = arith.constant 0 : i32
    return %arg0, %c0_i32 : i32, i32
  }
  func.func @transform_7(%arg0: i32) -> (i32, i32) {
    %c0_i32 = arith.constant 0 : i32
    %c0_i32_0 = arith.constant 0 : i32
    return %arg0, %c0_i32 : i32, i32
  }
}

</mosaic_0001>

<bundles_post_ra>
// kernel: tpu_custom_call.1
= control target key start
LH: loop header
LB: loop body
LE: loop exit
PB: predicated region body
PF: predicated region fallthrough
CT: control target
= control target key end

     0   :  { %s2000_s0 = inlined_call_operand.hbm [shape: f32[16,8,32], index: 0, kind: input, shape index: {}]   ;;  %s2001_s1 = inlined_call_operand.hbm [shape: f32[16,32], index: 1, kind: input, shape index: {}]   ;;  %s2002_s2 = inlined_call_operand.hbm [shape: bf16[32,128], index: 2, kind: input, shape index: {}]   ;;  %s2003_s3 = inlined_call_operand.hbm [shape: bf16[32,128], index: 3, kind: input, shape index: {}]   ;;  %s2004_s4 = inlined_call_operand.vmem [shape: f32[1,128], index: 4, kind: input, shape index: {}]   ;;  %s2005_s5 = inlined_call_operand.vmem [shape: f32[1,128], index: 5, kind: input, shape index: {}]   ;;  %s2006_s6 = inlined_call_operand.hbm [shape: f32[16,32], index: 6, kind: output, shape index: {0}]   ;;  %s2007_s7 = inlined_call_operand.vmem [shape: f32[16,8], index: 7, kind: output, shape index: {1}]  }
   0x1   :  { %2013 = sst [smem:[#allocation18_spill]] %s2000_s0 }
   0x2   :  { %2014 = sst [smem:[#allocation19_spill]] %s2002_s2 }
   0x3   :  { %2015 = sst [smem:[#allocation20_spill]] %s2003_s3 }
   0x4   :  { %13 = vsyncpa [#allocation3], 0 }
   0x5   :  { %15 = vsyncpa [#allocation3 + $0x1], 0 }
   0x6   :  { %16 = vsyncpa [#allocation6], 0 }
   0x7   :  { %18 = vsyncpa [#allocation6 + $0x1], 0 }
   0x8   :  { %19 = vsyncpa [#allocation9], 0 }
   0x9   :  { %20 = vsyncpa [#allocation4], 0 }
   0xa   :  { %22 = vsyncpa [#allocation4 + $0x1], 0  ;;  %s1577_s24 = smov 0   ;;  %s1579_s25 = smov 0  }
   0xb   :  { %s1581_s26 = smov 0   ;;  %s1583_s27 = smov 0  }
   0xc LB: > { %2016 = sst [smem:[#allocation16_spill]] %s1519_s26  ;;  %s1598_s28 = sadd.s32 4294967295, %s1523_s27   ;;  %s1523_s27 = sphi %s1583_s27, %s2042_s27   ;;  %s1519_s26 = sphi %s1581_s26, %s2039_s26   ;;  %s1515_s25 = sphi %s1579_s25, %s2041_s25   ;;  %s1511_s24 = sphi %s1577_s24, %s2040_s24  }
   0xd   : > { %s1144_s29 = sadd.s32 4294967294, %s1523_s27   ;;  %p48_p0 = scmp.ne.s32.totalorder %s1515_s25, %s1511_s24 }
   0xe   : > { %p2008_p1 = scmp.eq.s32.totalorder %s1598_s28, 0  ;;  %p188_p3 = scmp.eq.s32.totalorder %s1144_s29, 1 }
   0xf   : > { %p1145_p5 = scmp.ge.s32.totalorder %s1523_s27, 1  ;;  %p221_p7 = scmp.lt.s32.totalorder %s1523_s27, 3 }
  0x10   : > { %p1607_p4 = por %p2008_p1, %p48_p0  ;;  %p1612_p6 = por %p188_p3, %p48_p0 }
  0x11   : > { %p1617_p8 = pnand %p1145_p5, %p221_p7  ;;  %s1525_s10 = smov [#allocation7]  }
  0x12   : > { %s2017_s30 = scalar_select %p1607_p4, 1, 0 }
  0x13   : > { %s2018_s8 = scalar_select %p1612_p6, 1, 0 }
  0x14   : > { %s2019_s9 = scalar_select %p1617_p8, 1, 0 }
  0x15   : > { %s233_s11 = sshll.u32 %s1525_s10, 4  ;;  %p1228_p9 = pneg %p1617_p8  ;;  %s1621_s11 = int_to_ptr.vmem [resolvable:$true] %s233_s11 }
  0x16   : > { %s1526_s13 = smov [#allocation8]   ;;  %s2021_s2 = sld [smem:[#allocation19_spill]] }
  0x17   : > { %p1628_p11 = pnand %p1228_p9, %p2008_p1  ;;  %s246_s14 = sshll.u32 %s1526_s13, 4  ;;  %s1632_s14 = int_to_ptr.vmem [resolvable:$true] %s246_s14 }
  0x19   : > { %p1331_p13 = pneg %p1628_p11 }
  0x1c   : > { %s1329_s17 = scalar_lea.hbm %s2021_s2, 256 }
  0x1d   : > { %p1330_p12 = scmp.ne.s32.totalorder %s2021_s2, %s1329_s17  ;;  %p1336_p5 = scmp.lt.u32.totalorder %s1329_s17, %s2021_s2 }
  0x1f   : > { %p1332_p0 = pnand %p1331_p13, %p1330_p12 }
  0x21   : > { %p1333_p3 = pneg %p1332_p0 }
  0x23   : > { %p1338_p7 = pnand %p1336_p5, %p1333_p3 }
  0x25   : > { %1341 = shalt.err (!%p1338_p7)
}
  0x26   : > { %s1342_s22 = scalar_lea.vmem %s1621_s11, 256  ;;  %p1350_p2 = scmp.lt.s32.totalorder %s1621_s11, %s1621_s11 }
  0x27   : > { %p1343_p9 = scmp.ne.s32.totalorder %s1621_s11, %s1342_s22  ;;  %p1351_p12 = scmp.lt.s32.totalorder %s1342_s22, %s1342_s22 }
  0x29   : > { %p1345_p10 = pnand %p1343_p9, %p1331_p13  ;;  %p1352_p0 = por %p1351_p12, %p1350_p2 }
  0x2b   : > { %p1346_p1 = pneg %p1345_p10 }
  0x2d   : > { %p1353_p6 = pnand %p1352_p0, %p1346_p1 }
  0x2f   : > { %1356 = shalt.err (!%p1353_p6)
}
  0x30   : > { %s1527_s23 = smov 64   ;;  %s1528_s29 = smov 4  }
  0x31   : > { %1231 = dma.hbm_to_vmem [thread:$0]  (!%p1628_p11), %s2021_s2, 256, %s1621_s11, [#allocation6], %s1527_s23, %s1527_s23, %s1528_s29  }
  0x32   : > { %s2022_s3 = sld [smem:[#allocation20_spill]] }
  0x38   : > { %s1357_s17 = scalar_lea.hbm %s2022_s3, 256 }
  0x39   : > { %p1358_p2 = scmp.ne.s32.totalorder %s2022_s3, %s1357_s17  ;;  %p1364_p10 = scmp.lt.u32.totalorder %s1357_s17, %s2022_s3 }
  0x3b   : > { %p1360_p1 = pnand %p1358_p2, %p1331_p13 }
  0x3d   : > { %p1361_p6 = pneg %p1360_p1 }
  0x3f   : > { %p1366_p3 = pnand %p1364_p10, %p1361_p6 }
  0x41   : > { %1369 = shalt.err (!%p1366_p3)
}
  0x42   : > { %s1370_s11 = scalar_lea.vmem %s1632_s14, 256  ;;  %p1378_p12 = scmp.lt.s32.totalorder %s1632_s14, %s1632_s14 }
  0x43   : > { %p1371_p5 = scmp.ne.s32.totalorder %s1632_s14, %s1370_s11  ;;  %p1379_p0 = scmp.lt.s32.totalorder %s1370_s11, %s1370_s11 }
  0x45   : > { %p1373_p7 = pnand %p1371_p5, %p1331_p13  ;;  %p1380_p2 = por %p1379_p0, %p1378_p12 }
  0x47   : > { %p1374_p9 = pneg %p1373_p7 }
  0x49   : > { %p1381_p1 = pnand %p1380_p2, %p1374_p9 }
  0x4b   : > { %1384 = shalt.err (!%p1381_p1)
}
  0x4c   : > { %1234 = dma.hbm_to_vmem [thread:$0]  (!%p1628_p11), %s2022_s3, 256, %s1632_s14, [#allocation9], %s1527_s23, %s1527_s23, %s1528_s29  }
  0x4d   : > { %s1687_s13 = sadd.s32 1, %s1523_s27   ;;  %s35_s12 = sadd.s32 1, %s1519_s26 }
  0x4e   : > { %s32_s15 = ssub.s32 %s1523_s27, %s1687_s13  ;;  %p42_p13 = scmp.ne.s32.totalorder %s1519_s26, %s1515_s25 }
  0x4f   : > { %p33_p6 = scmp.eq.s32.totalorder %s32_s15, 0  ;;  %p43_p10 = scmp.eq.s32.totalorder %s1523_s27, 0 }
  0x50   : > { %p2023_p3 = scmp.eq.s32.totalorder %s1598_s28, 1  ;;  %p1248_p7 = scmp.lt.s32.totalorder %s1523_s27, 2 }
  0x51   : > { %s1703_s17 = scalar_select %p33_p6, %s1519_s26, %s35_s12  }
  0x52   : > { %p1697_p5 = por %p2023_p3, %p42_p13  ;;  %p44_p9 = por %p43_p10, %p42_p13 }
  0x53   : > { %2025 = sst [smem:[#allocation17_spill]] %s1703_s17  ;;  %s1706_s18 = sand.u32 1, %s1519_s26  }
  0x54   : > { %s2024_s16 = scalar_select %p1697_p5, 1, 0 }
  0x55   : > { %s1149_s14 = sshll.u32 %s1706_s18, 6  ;;  %s1180_s23 = sshll.u32 %s1523_s27, 10 }
  0x56   : > { %s2026_s0 = sld [smem:[#allocation18_spill]]  ;;  %s270_s21 = scalar_lea.vmem [#allocation2], %s1149_s14 }
  0x57   : > { %s277_s11 = sshll.u32 %s270_s21, 4  ;;  %p1717_p11 = pnand %p1248_p7, %p44_p9  ;;  %s1715_s11 = int_to_ptr.vmem [resolvable:$true] %s277_s11 }
  0x58   : > { %s267_s12 = scalar_lea.sflag [#allocation3], %s1706_s18 }
  0x59   : > { %p1387_p0 = pneg %p1717_p11 }
  0x5c   : > { %s1713_s20 = scalar_lea.hbm %s2026_s0, %s1180_s23  ;;  %s1390_s29 = scalar_lea.hbm %s2026_s0, 2048 }
  0x5d   : > { %s1385_s15 = scalar_lea.hbm %s1713_s20, 1024  ;;  %p1391_p13 = scmp.lt.u32.totalorder %s1713_s20, %s2026_s0 }
  0x5e   : > { %p1386_p12 = scmp.ne.s32.totalorder %s1713_s20, %s1385_s15  ;;  %p1392_p6 = scmp.lt.u32.totalorder %s1390_s29, %s1385_s15 }
  0x5f   : > { %p1394_p3 = scmp.lt.u32.totalorder %s1385_s15, %s1713_s20 }
  0x60   : > { %p1388_p2 = pnand %p1387_p0, %p1386_p12  ;;  %p1393_p10 = por %p1392_p6, %p1391_p13 }
  0x62   : > { %p1389_p1 = pneg %p1388_p2  ;;  %p1395_p7 = por %p1394_p3, %p1393_p10 }
  0x64   : > { %p1396_p9 = pnand %p1395_p7, %p1389_p1 }
  0x66   : > { %1399 = shalt.err (!%p1396_p9)
}
  0x67   : > { %s1400_s10 = scalar_lea.vmem %s1715_s11, 1024  ;;  %s1529_s14 = smov [#allocation2]  }
  0x68   : > { %p1401_p12 = scmp.ne.s32.totalorder %s1715_s11, %s1400_s10  ;;  %s1405_s23 = sshll.u32 %s1529_s14, 4  ;;  %s1406_s23 = int_to_ptr.vmem [resolvable:$false] %s1405_s23 }
  0x69   : > { %s1407_s19 = scalar_lea.vmem %s1406_s23, 2048  ;;  %p1408_p4 = scmp.lt.s32.totalorder %s1715_s11, %s1406_s23 }
  0x6a   : > { %p1403_p2 = pnand %p1401_p12, %p1387_p0  ;;  %p1409_p13 = scmp.lt.s32.totalorder %s1407_s19, %s1400_s10 }
  0x6c   : > { %p1404_p5 = pneg %p1403_p2  ;;  %p1410_p6 = por %p1409_p13, %p1408_p4 }
  0x6e   : > { %p1411_p10 = pnand %p1410_p6, %p1404_p5 }
  0x70   : > { %1414 = shalt.err (!%p1411_p10)
}
  0x71   : > { %s1530_s15 = smov 128   ;;  %s1531_s29 = smov 8  }
  0x72   : > { %1238 = dma.hbm_to_vmem [thread:$0]  (!%p1717_p11), %s1713_s20, 1024, %s1715_s11, %s267_s12, %s1530_s15, %s1530_s15, %s1531_s29  }
  0x73   : > { %s1152_s21 = sshll.u32 %s1706_s18, 3  ;;  %s1153_s14 = sshll.u32 %s1523_s27, 7 }
  0x74   : > { %s1755_s19 = scalar_lea.hbm %s2001_s1, %s1153_s14  ;;  %s291_s0 = scalar_lea.vmem [#allocation5], %s1152_s21 }
  0x75   : > { %s298_s2 = sshll.u32 %s291_s0, 4  ;;  %s2028_s3 = sand.u32 1, %s1523_s27   ;;  %s299_s2 = int_to_ptr.vmem [resolvable:$true] %s298_s2 }
  0x76   : > { %s288_s17 = scalar_lea.sflag [#allocation6], %s2028_s3  ;;  %s1415_s26 = scalar_lea.hbm %s1755_s19, 128 }
  0x77   : > { %p1416_p4 = scmp.ne.s32.totalorder %s1755_s19, %s1415_s26  ;;  %s1420_s11 = scalar_lea.hbm %s2001_s1, 256 }
  0x78   : > { %p1421_p3 = scmp.lt.u32.totalorder %s1755_s19, %s2001_s1  ;;  %p1422_p7 = scmp.lt.u32.totalorder %s1420_s11, %s1415_s26 }
  0x79   : > { %p1418_p5 = pnand %p1416_p4, %p1387_p0  ;;  %p1424_p12 = scmp.lt.u32.totalorder %s1415_s26, %s1755_s19 }
  0x7a   : > { %p1423_p9 = por %p1422_p7, %p1421_p3 }
  0x7b   : > { %p1419_p1 = pneg %p1418_p5 }
  0x7c   : > { %p1425_p2 = por %p1424_p12, %p1423_p9 }
  0x7e   : > { %p1426_p13 = pnand %p1425_p2, %p1419_p1 }
  0x80   : > { %1429 = shalt.err (!%p1426_p13)
}
  0x81   : > { %s1430_s0 = scalar_lea.vmem %s299_s2, 128  ;;  %s1532_s3 = smov [#allocation5]  }
  0x82   : > { %p1431_p6 = scmp.ne.s32.totalorder %s299_s2, %s1430_s0  ;;  %s1435_s29 = sshll.u32 %s1532_s3, 4  ;;  %s1436_s29 = int_to_ptr.vmem [resolvable:$false] %s1435_s29 }
  0x83   : > { %s1437_s21 = scalar_lea.vmem %s1436_s29, 256  ;;  %p1438_p5 = scmp.lt.s32.totalorder %s299_s2, %s1436_s29 }
  0x84   : > { %p1433_p10 = pnand %p1431_p6, %p1387_p0  ;;  %p1439_p8 = scmp.lt.s32.totalorder %s1437_s21, %s1430_s0 }
  0x86   : > { %p1434_p4 = pneg %p1433_p10  ;;  %p1440_p3 = por %p1439_p8, %p1438_p5 }
  0x88   : > { %p1441_p7 = pnand %p1440_p3, %p1434_p4 }
  0x8a   : > { %1444 = shalt.err (!%p1441_p7)
}
  0x8b   : > { %1241 = dma.hbm_to_vmem [thread:$0]  (!%p1717_p11), %s1755_s19, 128, %s299_s2, %s288_s17  }
  0x8c   : > { %p2029_p1 = scmp.ne.s32.totalorder %s2019_s9, 0 }
  0x8d   : > { %s1781_s26 = sand.u32 (!%p2029_p1), 1, %s1515_s25   ;;  %p2030_p8 = scmp.ne.s32.totalorder (!%p2029_p1), %s2017_s30, 0 }
  0x8e   : > { %307 = sbr.rel (%p2029_p1) target bundleno = 635 (0x27b), region = 44  ;;  %s1155_s14 = sshll.u32 (!%p2029_p1), %s1781_s26, 6 }
  0x8f   : > { %s310_s23 = scalar_lea.sflag (!%p2029_p1), [#allocation3], %s1781_s26  ;;  %s1785_s10 = scalar_lea.vmem (!%p2029_p1), [#allocation2], %s1155_s14 }
  0x95   : > { %1490 = dma.done.wait (%p2030_p8), %s310_s23, 1024  }
  0x96   : > { %1492 = vsyncadd (%p2030_p8), %s310_s23, 4294966272  ;;  %s318_s2 = sand.u32 1, %s1598_s28   ;;  %s1156_s9 = sshll.u32 %s1781_s26, 3 }
  0x97   : > { %s319_s17 = scalar_lea.sflag [#allocation6], %s318_s2  ;;  %s322_s22 = scalar_lea.vmem [#allocation5], %s1156_s9 }
  0x98   : > { %1494 = dma.done.wait (%p2030_p8), %s319_s17, 128  }
  0x99   : > { %1496 = vsyncadd (%p2030_p8), %s319_s17, 4294967168  ;;  %p2031_p11 = scmp.eq.s32.totalorder %s1598_s28, 0 }
  0x9b   : > { %1498 = dma.done.wait (%p2031_p11), [#allocation6], 256   ;;  %p2032_p0 = pmov %p2031_p11 }
  0x9d   : > { %1500 = vsyncadd (%p2032_p0), [#allocation6], 4294967040  ;;  %p2033_p9 = pmov %p2032_p0 }
  0x9e   : > { %p2034_p12 = pmov %p2032_p0 }
  0x9f   : > { %1502 = dma.done.wait (%p2033_p9), [#allocation9], 256  }
  0xa0   : > { %1504 = vsyncadd (%p2034_p12), [#allocation9], 4294967040  ;;  %v1533_v0 = vmov 0.0   ;;  %vm1534_vm0 = vmmov 0   ;;  %v1293_v1 = vld [vmem:[#allocation7] sm:$0xff]   ;;  %v1294_v2 = vld [vmem:[#allocation8] sm:$0xff]   ;;  %v579_v19 = vlaneseq }
  0xa1   : > { %1206 = vmatprep.subr.bf16.mxu1 %v1533_v0  ;;  %1210 = vmatprep.mubr.msk.bf16.mxu1 %vm1534_vm0, %v1533_v0  ;;  %v1295_v3 = vld [vmem:[#allocation7 + $0x8] sm:$0xff]   ;;  %v1296_v4 = vld [vmem:[#allocation8 + $0x8] sm:$0xff]   ;;  %v1808_v5 = vld [vmem:[%s1785_s10] sm:$0xff]  ;;  %vm428_vm1 = vcmask 261120   ;;  %v1535_v23 = vmov 1966171168  }
  0xa2   : > { %1194 = vmatprep.subr.bf16.mxu0 %v1293_v1  ;;  %1207 = vmatpush3.bf16.msra.mxu1 %v1294_v2  ;;  %v1811_v6 = vld [vmem:[%s1785_s10 + $0x8] sm:$0xff]  ;;  %v1816_v9 = vld [vmem:[%s1785_s10 + $0x10] sm:$0xff]  ;;  %v1819_v10 = vld [vmem:[%s1785_s10 + $0x18] sm:$0xff]  ;;  %v580_v20 = vshrl.u32 %v579_v19, 7  ;;  %v944_v21 = vand.u32 127, %v579_v19  ;;  %v577_v24 = vunpack.c.l.s4 %v1535_v23  ;;  %vm919_vm2 = vcmask 1041409  }
  0xa3   : > { %1195 = vmatpush3.bf16.msra.mxu0 %v1293_v1  ;;  %1208 = vmatprep.subr.bf16.mxu1 %v1533_v0  ;;  %v506_v7 = vld [vmem:[%s322_s22] sm:$0xff]  ;;  %v1181_v8 = vpack.c.bf16 %v1811_v6, %v1808_v5  ;;  %v1182_v13 = vpack.c.bf16 %v1819_v10, %v1816_v9  ;;  %v1836_v16 = vld [vmem:[%s1785_s10 + $0x30] sm:$0xff]  ;;  %v1839_v17 = vld [vmem:[%s1785_s10 + $0x38] sm:$0xff]  ;;  %vm921_vm3 = vcmask 1042434   ;;  %vm923_vm4 = vcmask 1043459   ;;  %p371_p2 = scmp.lt.s32.totalorder %s1598_s28, 1 }
  0xa4   : > { %1196 = vmatprep.subr.bf16.mxu0 %v1295_v3  ;;  %v1822_v11 = vld [vmem:[%s1785_s10 + $0x20] sm:$0xff]  ;;  %v507_v12 = vpack.c.bf16 %v506_v7, %v506_v7  ;;  %v1827_v14 = vld [vmem:[%s1785_s10 + $0x28] sm:$0xff]  ;;  %v1184_v18 = vpack.c.bf16 %v1839_v17, %v1836_v16  ;;  %v1844_v22 = vsub.s32 %v944_v21, %v580_v20  ;;  %v578_v25 = vunpack.c.0.s8 %v577_v24  ;;  %s1177_s29 = sshll.u32 %s1598_s28, 7  ;;  %s363_s21 = scalar_lea.vmem [#allocation10], %s1156_s9 }
  0xa5   : > { %v1183_v15 = vpack.c.bf16 %v1827_v14, %v1822_v11  ;;  %1198 = vmatprep.mubr.msk.bf16.mxu0 %vm428_vm1, %v1181_v8  ;;  %v1171_v26 = vld [vmem:[%s2005_s5] ss:$0 sm:$0xff]  ;;  %v626_v37 = vsub.s32 0, %v580_v20  ;;  %vm925_vm5 = vcmask 1044484   ;;  %vm927_vm6 = vcmask 1045509   ;;  %s1924_s11 = scalar_select %p371_p2, %s1598_s28, 1 }
  0xa6   : > { %1209 = vmatpush3.bf16.msra.mxu1 %v1296_v4  ;;  %v581_v27 = vsub.s32 %v578_v25, %v580_v20  ;;  %v1175_v58 = vld [vmem:[%s2004_s4] ss:$0 sm:$0xff]  ;;  %vm929_vm7 = vcmask 1046534   ;;  %vm931_vm8 = vcmask 1047559   ;;  %vm985_vm9 = vcmask 64512   ;;  %s1005_s14 = sshll.u32 %s363_s21, 4  ;;  %s1954_s2 = scalar_lea.hbm %s2006_s6, %s1177_s29  ;;  %s1956_s14 = int_to_ptr.vmem [resolvable:$true] %s1005_s14 }
  0xa7   : > { %1197 = vmatpush3.bf16.msra.mxu0 %v1295_v3  ;;  %s1160_s12 = sshll.u32 %s1924_s11, 3  ;;  %s988_s28 = scalar_lea.sflag [#allocation4], %s1781_s26 }
  0xa8   : > { %s374_s3 = scalar_lea.vmem %s2007_s7, %s1160_s12  ;;  %s1445_s9 = scalar_lea.vmem %s1956_s14, 128 }
  0xa9   : > { %1211 = vmatmul.mubr.msk.bf16.vlgmr.msra.gmra.mrb[0].mxu1 %vm428_vm1, %v507_v12  ;;  %p1446_p13 = scmp.ne.s32.totalorder %s1956_s14, %s1445_s9  ;;  %p2035_p6 = scmp.ne.s32.totalorder %s2024_s16, 0 }
  0xaa   : > { %1199 = vmatmul.mubr.msk.bf16.vlgmr.msra.gmra.mrb[0].mxu0 %vm428_vm1, %v1182_v13  ;;  %s1536_s17 = smov [#allocation10]  }
  0xab   : > { %1202 = vmatprep.mubr.msk.bf16.mxu0 %vm428_vm1, %v1183_v15  ;;  %p1447_p10 = pnand %p1446_p13, %p2035_p6  ;;  %s1449_s22 = sshll.u32 %s1536_s17, 4  ;;  %s1450_s22 = int_to_ptr.vmem [resolvable:$false] %s1449_s22 }
  0xac   : > { %s1451_s30 = scalar_lea.vmem %s1450_s22, 256  ;;  %p1452_p5 = scmp.lt.s32.totalorder %s1956_s14, %s1450_s22 }
  0xad   : > { %p1448_p4 = pneg %p1447_p10  ;;  %p1453_p3 = scmp.lt.s32.totalorder %s1451_s30, %s1445_s9 }
  0xaf   : > { %p1454_p7 = por %p1453_p3, %p1452_p5 }
  0xb1   : > { %p1455_p1 = pnand %p1454_p7, %p1448_p4 }
  0xb2   : > { %1203 = vmatmul.mubr.msk.bf16.gmra.mrb[4].mxu0 %vm428_vm1, %v1184_v18 }
 0x17c   : > { %v568_v28 = vpop.f32.mrb[0].mxu1 }
 0x17d   : > { %v1200_v29 = vpop.f32.mrb[0].mxu0  ;;  %v569_v30 = vadd.f32 %v1171_v26, %v568_v28  ;;  %v1212_v31 = vpop.f32.mrb[1].mxu1 }
 0x17e   : > { %v475_v32 = vpop.f32.mrb[1].mxu0  ;;  %v571_v33 = vpop.f32.mrb[2].mxu1 }
 0x17f   : > { %v1201_v34 = vpop.f32.mrb[2].mxu0  ;;  %v575_v35 = vcombine.high %v569_v30, %v569_v30  ;;  %v582_v36 = vrot.slane %v569_v30, %v581_v27  ;;  %v1213_v38 = vpop.f32.mrb[3].mxu1 }
 0x180   : > { %v478_v39 = vpop.f32.mrb[3].mxu0 }
 0x181   : > { %v589_v40 = vrot.slane %v575_v35, %v581_v27  ;;  %v590_v41 = vcombine.high %v582_v36, %v582_v36  ;;  %v598_v42 = vrot.slane %v582_v36, %v581_v27 }
 0x183   : > { %v591_v43 = vcombine.high %v589_v40, %v589_v40  ;;  %v620_v44 = vcombine.high %v598_v42, %v598_v42  ;;  %v627_v45 = vrot.slane %v598_v42, %v626_v37  ;;  %v612_v46 = vrot.slane %v590_v41, %v581_v27 }
 0x184   : > { %v605_v48 = vrot.slane %v589_v40, %v581_v27 }
 0x185   : > { %v1204_v47 = vpop.f32.mrb[4].mxu0  ;;  %v635_v49 = vrot.slane %v620_v44, %v626_v37  ;;  %v664_v50 = vadd.f32 %v627_v45, %v475_v32  ;;  %v622_v51 = vcombine.high %v612_v46, %v612_v46  ;;  %v631_v52 = vrot.slane %v612_v46, %v626_v37 }
 0x186   : > { %v491_v53 = vpop.f32.mrb[5].mxu0  ;;  %v621_v54 = vcombine.high %v605_v48, %v605_v48  ;;  %v643_v55 = vrot.slane %v605_v48, %v626_v37  ;;  %v619_v57 = vrot.slane %v591_v43, %v581_v27 }
 0x187   : > { %v1205_v56 = vpop.f32.mrb[6].mxu0  ;;  %v666_v59 = vadd.f32 %v1200_v29, %v635_v49  ;;  %v672_v60 = vmax.f32 %v664_v50, 0.0  ;;  %v639_v61 = vrot.slane %v622_v51, %v626_v37  ;;  %v665_v62 = vadd.f32 %v631_v52, %v478_v39 }
 0x188   : > { %v494_v63 = vpop.f32.mrb[7].mxu0  ;;  %v651_v0 = vrot.slane %v621_v54, %v626_v37  ;;  %v668_v1 = vadd.f32 %v643_v55, %v491_v53  ;;  %v623_v2 = vcombine.high %v619_v57, %v619_v57  ;;  %v647_v3 = vrot.slane %v619_v57, %v626_v37 }
 0x189   : > { %v674_v4 = vmax.f32 %v666_v59, 0.0  ;;  %v667_v7 = vadd.f32 %v1201_v34, %v639_v61  ;;  %v673_v8 = vmax.f32 %v665_v62, 0.0  ;;  %v687_v12 = vmul.f32 %v1175_v58, %v672_v60 }
 0x18a   : > { %v670_v13 = vadd.f32 %v1204_v47, %v651_v0  ;;  %v655_v15 = vrot.slane %v623_v2, %v626_v37  ;;  %v669_v18 = vadd.f32 %v647_v3, %v494_v63  ;;  %v676_v23 = vmax.f32 %v668_v1, 0.0 }
 0x18b   : > { %v675_v19 = vmax.f32 %v667_v7, 0.0  ;;  %695 = vadd.xlane.f32.xlu0 %v687_v12  ;;  %v689_v20 = vmul.f32 %v1175_v58, %v674_v4  ;;  %v688_v24 = vmul.f32 %v1175_v58, %v673_v8 }
 0x18c   : > { %v671_v21 = vadd.f32 %v1205_v56, %v655_v15  ;;  %v677_v25 = vmax.f32 %v669_v18, 0.0  ;;  %v678_v27 = vmax.f32 %v670_v13, 0.0  ;;  %v691_v28 = vmul.f32 %v1175_v58, %v676_v23 }
 0x18d   : > { %699 = vadd.xlane.f32.xlu1 %v689_v20  ;;  %v690_v26 = vmul.f32 %v1175_v58, %v675_v19 }
 0x18e   : > { %v679_v29 = vmax.f32 %v671_v21, 0.0  ;;  %v692_v30 = vmul.f32 %v1175_v58, %v677_v25  ;;  %v693_v31 = vmul.f32 %v1175_v58, %v678_v27 }
 0x18f   : > { %697 = vadd.xlane.f32.xlu0 %v688_v24 }
 0x190   : > { %v694_v32 = vmul.f32 %v1175_v58, %v679_v29 }
 0x191   : > { %701 = vadd.xlane.f32.xlu1 %v690_v26 }
 0x193   : > { %703 = vadd.xlane.f32.xlu0 %v691_v28 }
 0x195   : > { %705 = vadd.xlane.f32.xlu1 %v692_v30 }
 0x197   : > { %707 = vadd.xlane.f32.xlu0 %v693_v31 }
 0x199   : > { %709 = vadd.xlane.f32.xlu1 %v694_v32 }
 0x218   : > { %v696_v33 = vpop.xlane.xlu0 %695 }
 0x219   : > { %v711_v34 = vrot.slane %v696_v33, 4 }
 0x21a   : > { %v700_v35 = vpop.xlane.xlu1 %699 }
 0x21b   : > { %v712_v36 = vmax.f32 %v696_v33, %v711_v34  ;;  %v723_v37 = vrot.slane %v700_v35, 4 }
 0x21c   : > { %v698_v38 = vpop.xlane.xlu0 %697 }
 0x21d   : > { %v713_v39 = vrot.slane %v712_v36, 2  ;;  %v724_v40 = vmax.f32 %v700_v35, %v723_v37  ;;  %v717_v41 = vrot.slane %v698_v38, 4 }
 0x21e   : > { %v702_v42 = vpop.xlane.xlu1 %701 }
 0x21f   : > { %v714_v43 = vmax.f32 %v712_v36, %v713_v39  ;;  %v725_v44 = vrot.slane %v724_v40, 2  ;;  %v718_v45 = vmax.f32 %v698_v38, %v717_v41  ;;  %v729_v46 = vrot.slane %v702_v42, 4 }
 0x220   : > { %v704_v47 = vpop.xlane.xlu0 %703 }
 0x221   : > { %v715_v48 = vrot.slane %v714_v43, 1  ;;  %v726_v49 = vmax.f32 %v724_v40, %v725_v44  ;;  %v719_v50 = vrot.slane %v718_v45, 2  ;;  %v730_v51 = vmax.f32 %v702_v42, %v729_v46 }
 0x222   : > { %v735_v52 = vrot.slane %v704_v47, 4  ;;  %v706_v53 = vpop.xlane.xlu1 %705 }
 0x223   : > { %v716_v54 = vmax.f32 %v714_v43, %v715_v48  ;;  %v727_v55 = vrot.slane %v726_v49, 1  ;;  %v720_v56 = vmax.f32 %v718_v45, %v719_v50  ;;  %v731_v57 = vrot.slane %v730_v51, 2 }
 0x224   : > { %v736_v58 = vmax.f32 %v704_v47, %v735_v52  ;;  %v741_v59 = vrot.slane %v706_v53, 4  ;;  %v708_v60 = vpop.xlane.xlu0 %707 }
 0x225   : > { %v759_v61 = vsub.f32 %v696_v33, %v716_v54  ;;  %v728_v62 = vmax.f32 %v726_v49, %v727_v55  ;;  %v721_v63 = vrot.slane %v720_v56, 1  ;;  %v732_v0 = vmax.f32 %v730_v51, %v731_v57 }
 0x226   : > { %v737_v1 = vrot.slane %v736_v58, 2  ;;  %v742_v2 = vmax.f32 %v706_v53, %v741_v59  ;;  %v747_v3 = vrot.slane %v708_v60, 4  ;;  %v710_v4 = vpop.xlane.xlu1 %709 }
 0x227   : > { %v767_v7 = vmul.f32 1.442695, %v759_v61  ;;  %v761_v8 = vsub.f32 %v700_v35, %v728_v62  ;;  %v722_v12 = vmax.f32 %v720_v56, %v721_v63  ;;  %v733_v13 = vrot.slane %v732_v0, 1 }
 0x228   : > { %v738_v15 = vmax.f32 %v736_v58, %v737_v1  ;;  %v743_v18 = vrot.slane %v742_v2, 2  ;;  %v748_v19 = vmax.f32 %v708_v60, %v747_v3  ;;  %v753_v20 = vrot.slane %v710_v4, 4 }
 0x229   : > { %1297 = vpow2.f32 %v767_v7  ;;  %v771_v21 = vmul.f32 1.442695, %v761_v8  ;;  %v760_v23 = vsub.f32 %v698_v38, %v722_v12  ;;  %v734_v24 = vmax.f32 %v732_v0, %v733_v13 }
 0x22a   : > { %v739_v25 = vrot.slane %v738_v15, 1  ;;  %v744_v26 = vmax.f32 %v742_v2, %v743_v18  ;;  %v749_v27 = vrot.slane %v748_v19, 2  ;;  %v754_v28 = vmax.f32 %v710_v4, %v753_v20 }
 0x22b   : > { %1299 = vpow2.f32 %v771_v21  ;;  %v769_v29 = vmul.f32 1.442695, %v760_v23  ;;  %v762_v30 = vsub.f32 %v702_v42, %v734_v24 }
 0x22c   : > { %v740_v31 = vmax.f32 %v738_v15, %v739_v25  ;;  %v745_v32 = vrot.slane %v744_v26, 1  ;;  %v750_v33 = vmax.f32 %v748_v19, %v749_v27  ;;  %v755_v34 = vrot.slane %v754_v28, 2 }
 0x22d   : > { %1301 = vpow2.f32 %v769_v29  ;;  %v773_v35 = vmul.f32 1.442695, %v762_v30 }
 0x22e   : > { %v763_v36 = vsub.f32 %v704_v47, %v740_v31  ;;  %v746_v37 = vmax.f32 %v744_v26, %v745_v32  ;;  %v751_v39 = vrot.slane %v750_v33, 1  ;;  %v756_v40 = vmax.f32 %v754_v28, %v755_v34 }
 0x22f   : > { %1303 = vpow2.f32 %v773_v35 }
 0x230   : > { %v775_v38 = vmul.f32 1.442695, %v763_v36  ;;  %v764_v41 = vsub.f32 %v706_v53, %v746_v37  ;;  %v752_v43 = vmax.f32 %v750_v33, %v751_v39  ;;  %v757_v44 = vrot.slane %v756_v40, 1 }
 0x232   : > { %1305 = vpow2.f32 %v775_v38  ;;  %v777_v45 = vmul.f32 1.442695, %v764_v41  ;;  %v765_v46 = vsub.f32 %v708_v60, %v752_v43  ;;  %v758_v48 = vmax.f32 %v756_v40, %v757_v44 }
 0x233   : > { %v1852_v42 = vpop.eup %1297 }
 0x234   : > { %v783_v49 = vrot.slane %v1852_v42, 4  ;;  %1307 = vpow2.f32 %v777_v45  ;;  %v779_v50 = vmul.f32 1.442695, %v765_v46  ;;  %v766_v51 = vsub.f32 %v710_v4, %v758_v48 }
 0x235   : > { %v1855_v47 = vpop.eup %1299 }
 0x236   : > { %v784_v52 = vadd.f32 %v1852_v42, %v783_v49  ;;  %v795_v54 = vrot.slane %v1855_v47, 4  ;;  %1309 = vpow2.f32 %v779_v50  ;;  %v781_v53 = vmul.f32 1.442695, %v766_v51 }
 0x237   : > { %v1859_v55 = vpop.eup %1301 }
 0x238   : > { %v785_v56 = vrot.slane %v784_v52, 2  ;;  %v796_v57 = vadd.f32 %v1855_v47, %v795_v54  ;;  %v789_v58 = vrot.slane %v1859_v55, 4  ;;  %1311 = vpow2.f32 %v781_v53 }
 0x239   : > { %v1863_v59 = vpop.eup %1303 }
 0x23a   : > { %v786_v60 = vadd.f32 %v785_v56, %v784_v52  ;;  %v797_v61 = vrot.slane %v796_v57, 2  ;;  %v790_v62 = vadd.f32 %v1859_v55, %v789_v58  ;;  %v801_v63 = vrot.slane %v1863_v59, 4 }
 0x23c   : > { %v1867_v0 = vpop.eup %1305  ;;  %v787_v1 = vrot.slane %v786_v60, 1  ;;  %v798_v2 = vadd.f32 %v797_v61, %v796_v57  ;;  %v791_v3 = vrot.slane %v790_v62, 2  ;;  %v802_v4 = vadd.f32 %v1863_v59, %v801_v63 }
 0x23d   : > { %v807_v7 = vrot.slane %v1867_v0, 4 }
 0x23e   : > { %v1871_v8 = vpop.eup %1307  ;;  %v788_v12 = vadd.f32 %v787_v1, %v786_v60  ;;  %v799_v13 = vrot.slane %v798_v2, 1  ;;  %v792_v15 = vadd.f32 %v791_v3, %v790_v62  ;;  %v803_v18 = vrot.slane %v802_v4, 2 }
 0x23f   : > { %v808_v19 = vadd.f32 %v1867_v0, %v807_v7  ;;  %v813_v20 = vrot.slane %v1871_v8, 4 }
 0x240   : > { %v1875_v21 = vpop.eup %1309  ;;  %1313 = vrcp.f32 %v788_v12  ;;  %v800_v23 = vadd.f32 %v799_v13, %v798_v2  ;;  %v793_v24 = vrot.slane %v792_v15, 1  ;;  %v804_v25 = vadd.f32 %v803_v18, %v802_v4 }
 0x241   : > { %v809_v26 = vrot.slane %v808_v19, 2  ;;  %v814_v27 = vadd.f32 %v1871_v8, %v813_v20  ;;  %v819_v28 = vrot.slane %v1875_v21, 4 }
 0x242   : > { %v1879_v29 = vpop.eup %1311  ;;  %1315 = vrcp.f32 %v800_v23  ;;  %v794_v30 = vadd.f32 %v793_v24, %v792_v15  ;;  %v805_v31 = vrot.slane %v804_v25, 1 }
 0x243   : > { %v810_v32 = vadd.f32 %v809_v26, %v808_v19  ;;  %v815_v33 = vrot.slane %v814_v27, 2  ;;  %v820_v34 = vadd.f32 %v1875_v21, %v819_v28  ;;  %v825_v35 = vrot.slane %v1879_v29, 4 }
 0x244   : > { %1317 = vrcp.f32 %v794_v30  ;;  %v806_v36 = vadd.f32 %v805_v31, %v804_v25 }
 0x245   : > { %v811_v37 = vrot.slane %v810_v32, 1  ;;  %v816_v39 = vadd.f32 %v815_v33, %v814_v27  ;;  %v821_v40 = vrot.slane %v820_v34, 2  ;;  %v826_v38 = vadd.f32 %v1879_v29, %v825_v35 }
 0x246   : > { %1319 = vrcp.f32 %v806_v36 }
 0x247   : > { %v812_v41 = vadd.f32 %v811_v37, %v810_v32  ;;  %v817_v43 = vrot.slane %v816_v39, 1  ;;  %v822_v44 = vadd.f32 %v821_v40, %v820_v34  ;;  %v827_v45 = vrot.slane %v826_v38, 2 }
 0x249   : > { %1321 = vrcp.f32 %v812_v41  ;;  %v818_v46 = vadd.f32 %v817_v43, %v816_v39  ;;  %v823_v48 = vrot.slane %v822_v44, 1  ;;  %v828_v49 = vadd.f32 %v827_v45, %v826_v38 }
 0x24a   : > { %v1314_v50 = vpop.eup %1313 }
 0x24b   : > { %v832_v51 = vmul.f32 %v1314_v50, %v1852_v42  ;;  %1323 = vrcp.f32 %v818_v46  ;;  %v824_v52 = vadd.f32 %v823_v48, %v822_v44  ;;  %v829_v54 = vrot.slane %v828_v49, 1 }
 0x24c   : > { %v1316_v53 = vpop.eup %1315 }
 0x24d   : > { %v847_v56 = vmul.f32 %v832_v51, %v1808_v5  ;;  %v836_v57 = vmul.f32 %v1316_v53, %v1855_v47  ;;  %1325 = vrcp.f32 %v824_v52  ;;  %v830_v60 = vadd.f32 %v829_v54, %v828_v49 }
 0x24e   : > { %v1318_v58 = vpop.eup %1317  ;;  %v948_v42 = vrot.slane %v832_v51, %v1844_v22 }
 0x24f   : > { %v849_v61 = vmul.f32 %v836_v57, %v1816_v9  ;;  %v834_v62 = vmul.f32 %v1318_v58, %v1859_v55  ;;  %v855_v63 = vsel %vm428_vm1, %v847_v56, 0.0  ;;  %1327 = vrcp.f32 %v830_v60 }
 0x250   : > { %v1320_v1 = vpop.eup %1319  ;;  %v856_v2 = vrot.slane %v855_v63, 4  ;;  %v956_v55 = vrot.slane %v836_v57, %v1844_v22 }
 0x251   : > { %v848_v5 = vmul.f32 %v834_v62, %v1811_v6  ;;  %v952_v47 = vrot.slane %v834_v62, %v1844_v22  ;;  %v838_v3 = vmul.f32 %v1320_v1, %v1863_v59  ;;  %v869_v4 = vsel %vm428_vm1, %v849_v61, 0.0 }
 0x252   : > { %v857_v9 = vadd.f32 %v856_v2, %v855_v63  ;;  %v870_v7 = vrot.slane %v869_v4, 4 }
 0x253   : > { %v1322_v12 = vpop.eup %1321  ;;  %v850_v13 = vmul.f32 %v838_v3, %v1819_v10  ;;  %v862_v15 = vsel %vm428_vm1, %v848_v5, 0.0  ;;  %v960_v18 = vrot.slane %v838_v3, %v1844_v22  ;;  %v977_v6 = vsel %vm919_vm2, %v952_v47, %v948_v42 }
 0x254   : > { %v1901_v19 = vmul.f32 %v1322_v12, %v1867_v0  ;;  %v858_v59 = vrot.slane %v857_v9, 2  ;;  %v863_v20 = vrot.slane %v862_v15, 4  ;;  %v871_v23 = vadd.f32 %v870_v7, %v869_v4 }
 0x255   : > { %v1324_v24 = vpop.eup %1323  ;;  %v876_v25 = vsel %vm428_vm1, %v850_v13, 0.0  ;;  %v978_v26 = vsel %vm921_vm3, %v956_v55, %v977_v6 }
 0x256   : > { %v1906_v10 = vmul.f32 %v1324_v24, %v1871_v8  ;;  %v851_v27 = vmul.f32 %v1901_v19, %v1822_v11  ;;  %v859_v28 = vadd.f32 %v858_v59, %v857_v9  ;;  %v864_v30 = vadd.f32 %v863_v20, %v862_v15 }
 0x257   : > { %v1326_v31 = vpop.eup %1325  ;;  %v872_v0 = vrot.slane %v871_v23, 2  ;;  %v877_v32 = vrot.slane %v876_v25, 4  ;;  %v964_v33 = vrot.slane %v1901_v19, %v1844_v22  ;;  %v979_v34 = vsel %vm923_vm4, %v960_v18, %v978_v26 }
 0x258   : > { %v844_v35 = vmul.f32 %v1326_v31, %v1875_v21  ;;  %v852_v11 = vmul.f32 %v1906_v10, %v1827_v14  ;;  %v860_v8 = vrot.slane %v859_v28, 1  ;;  %v865_v36 = vrot.slane %v864_v30, 2 }
 0x259   : > { %v873_v37 = vadd.f32 %v872_v0, %v871_v23  ;;  %v878_v39 = vadd.f32 %v877_v32, %v876_v25  ;;  %v883_v40 = vsel %vm428_vm1, %v851_v27, 0.0  ;;  %v968_v38 = vrot.slane %v1906_v10, %v1844_v22  ;;  %v1328_v41 = vpop.eup %1327 }
 0x25a   : > { %v853_v43 = vmul.f32 %v844_v35, %v1836_v16  ;;  %v861_v21 = vadd.f32 %v860_v8, %v859_v28  ;;  %v866_v44 = vadd.f32 %v865_v36, %v864_v30  ;;  %v884_v45 = vrot.slane %v883_v40, 4 }
 0x25b   : > { %v846_v14 = vmul.f32 %v1328_v41, %v1879_v29  ;;  %v874_v46 = vrot.slane %v873_v37, 1  ;;  %v879_v48 = vrot.slane %v878_v39, 2  ;;  %v890_v49 = vsel %vm428_vm1, %v852_v11, 0.0 }
 0x25c   : > { %v867_v50 = vrot.slane %v866_v44, 1  ;;  %v885_v51 = vadd.f32 %v884_v45, %v883_v40  ;;  %v891_v52 = vrot.slane %v890_v49, 4  ;;  %v897_v54 = vsel %vm428_vm1, %v853_v43, 0.0 }
 0x25d   : > { %v854_v16 = vmul.f32 %v846_v14, %v1839_v17  ;;  %v875_v53 = vadd.f32 %v874_v46, %v873_v37  ;;  %v880_v56 = vadd.f32 %v879_v48, %v878_v39  ;;  %v898_v57 = vrot.slane %v897_v54, 4 }
 0x25e   : > { %v868_v58 = vadd.f32 %v867_v50, %v866_v44  ;;  %v886_v60 = vrot.slane %v885_v51, 2  ;;  %v892_v61 = vadd.f32 %v891_v52, %v890_v49  ;;  %v972_v29 = vrot.slane %v844_v35, %v1844_v22 }
 0x25f   : > { %v881_v62 = vrot.slane %v880_v56, 1  ;;  %v899_v63 = vadd.f32 %v898_v57, %v897_v54  ;;  %v904_v1 = vsel %vm428_vm1, %v854_v16, 0.0  ;;  %v976_v42 = vrot.slane %v846_v14, %v1844_v22 }
 0x260   : > { %v887_v2 = vadd.f32 %v886_v60, %v885_v51  ;;  %v893_v5 = vrot.slane %v892_v61, 2  ;;  %v905_v47 = vrot.slane %v904_v1, 4  ;;  %v920_v17 = vsel %vm919_vm2, %v868_v58, %v861_v21 }
 0x261   : > { %v882_v3 = vadd.f32 %v881_v62, %v880_v56  ;;  %v900_v4 = vrot.slane %v899_v63, 2  ;;  %v922_v9 = vsel %vm921_vm3, %v875_v53, %v920_v17  ;;  %v980_v7 = vsel %vm925_vm5, %v964_v33, %v979_v34 }
 0x262   : > { %v888_v55 = vrot.slane %v887_v2, 1  ;;  %v894_v12 = vadd.f32 %v893_v5, %v892_v61  ;;  %v906_v13 = vadd.f32 %v905_v47, %v904_v1  ;;  %v981_v22 = vsel %vm927_vm6, %v968_v38, %v980_v7 }
 0x263   : > { %v901_v15 = vadd.f32 %v900_v4, %v899_v63  ;;  %v924_v18 = vsel %vm923_vm4, %v882_v3, %v922_v9  ;;  %v982_v6 = vsel %vm929_vm7, %v972_v29, %v981_v22 }
 0x264   : > { %v889_v19 = vadd.f32 %v888_v55, %v887_v2  ;;  %v895_v59 = vrot.slane %v894_v12, 1  ;;  %v907_v20 = vrot.slane %v906_v13, 2  ;;  %v983_v23 = vsel %vm931_vm8, %v976_v42, %v982_v6 }
 0x265   : > { %v902_v24 = vrot.slane %v901_v15, 1  ;;  %986 = vst.msk [vmem:[%s374_s3] sm:$0xff] %vm985_vm9, %v983_v23 }
 0x266   : > { %v896_v25 = vadd.f32 %v895_v59, %v894_v12  ;;  %v908_v26 = vadd.f32 %v907_v20, %v906_v13  ;;  %v926_v10 = vsel %vm925_vm5, %v889_v19, %v924_v18 }
 0x267   : > { %v903_v27 = vadd.f32 %v902_v24, %v901_v15 }
 0x268   : > { %v909_v28 = vrot.slane %v908_v26, 1  ;;  %v928_v30 = vsel %vm927_vm6, %v896_v25, %v926_v10 }
 0x269   : > { %v930_v31 = vsel %vm929_vm7, %v903_v27, %v928_v30 }
 0x26a   : > { %v910_v0 = vadd.f32 %v909_v28, %v908_v26 }
 0x26c   : > { %v932_v32 = vsel %vm931_vm8, %v910_v0, %v930_v31 }
 0x26d   : > { %934 = vst.msk [vmem:[%s363_s21] sm:$0xff] %vm428_vm1, %v932_v32 }
 0x26e   : > { %1458 = shalt.err (!%p1455_p1)
}
 0x26f   : > { %s1459_s26 = scalar_lea.hbm %s1954_s2, 128  ;;  %s1463_s20 = scalar_lea.hbm %s2006_s6, 256 }
 0x270   : > { %p1460_p8 = scmp.ne.s32.totalorder %s1954_s2, %s1459_s26  ;;  %p1464_p9 = scmp.lt.u32.totalorder %s1954_s2, %s2006_s6 }
 0x271   : > { %p1465_p12 = scmp.lt.u32.totalorder %s1463_s20, %s1459_s26  ;;  %p1467_p13 = scmp.lt.u32.totalorder %s1459_s26, %s1954_s2 }
 0x272   : > { %p1461_p11 = pnand %p1460_p8, %p2035_p6 }
 0x273   : > { %p1466_p2 = por %p1465_p12, %p1464_p9 }
 0x274   : > { %p1462_p0 = pneg %p1461_p11 }
 0x275   : > { %p1468_p10 = por %p1467_p13, %p1466_p2 }
 0x277   : > { %p1469_p4 = pnand %p1468_p10, %p1462_p0 }
 0x279   : > { %1472 = shalt.err (!%p1469_p4)
}
 0x27a   : > { %1226 = dma.vmem_to_hbm [thread:$0]  (%p2035_p6), %s1956_s14, 128, %s1954_s2, %s988_s28  }
 0x27b PF: > { %s1020_s15 = sand.u32 1, %s1511_s24   ;;  %p2036_p5 = scmp.ne.s32.totalorder %s2018_s8, 0 }
 0x27c   : > { %p2037_p3 = scmp.ge.s32.totalorder %s1523_s27, 2  ;;  %s1021_s0 = scalar_lea.sflag [#allocation4], %s1020_s15 }
 0x27e   : > { %p1243_p7 = pnand %p2037_p3, %p2036_p5 }
 0x280   : > { %1506 = dma.done.wait (!%p1243_p7), %s1021_s0, 128  }
 0x281   : > { %1508 = vsyncadd (!%p1243_p7), %s1021_s0, 4294967168  ;;  %s2038_s3 = sld [smem:[#allocation16_spill]]  ;;  %s2039_s26 = sld [smem:[#allocation17_spill]] }
 0x282   : > { %p25_p1 = scmp.ge.s32.totalorder %s1687_s13, 4   ;;  %s2040_s24 = smov %s1515_s25 }
 0x283   : > { %s2042_s27 = smov %s1687_s13 }
 0x284   :  { %27 = sbr.rel (!%p25_p1) target bundleno = 12 (0xc), region = 122 }
 0x287   : > { %s2041_s25 = smov %s2038_s3 }
 0x28b   :  { %1033 = vsyncpa [#allocation3], 1 }
 0x28c   :  { %1035 = vsyncpa [#allocation3 + $0x1], 1 }
 0x28d   :  { %1036 = vsyncpa [#allocation6], 1 }
 0x28e   :  { %1038 = vsyncpa [#allocation6 + $0x1], 1 }
 0x28f   :  { %1039 = vsyncpa [#allocation9], 1 }
 0x290   :  { %1040 = vsyncpa [#allocation4], 1 }
 0x291   :  { %1042 = vsyncpa [#allocation4 + $0x1], 1 }

// kernel: tpu_custom_call.1
= control target key start
LH: loop header
LB: loop body
LE: loop exit
PB: predicated region body
PF: predicated region fallthrough
CT: control target
= control target key end

     0   :  { %s2000_s0 = inlined_call_operand.hbm [shape: f32[16,8,32], index: 0, kind: input, shape index: {}]   ;;  %s2001_s1 = inlined_call_operand.hbm [shape: f32[16,32], index: 1, kind: input, shape index: {}]   ;;  %s2002_s2 = inlined_call_operand.hbm [shape: bf16[32,128], index: 2, kind: input, shape index: {}]   ;;  %s2003_s3 = inlined_call_operand.hbm [shape: bf16[32,128], index: 3, kind: input, shape index: {}]   ;;  %s2004_s4 = inlined_call_operand.vmem [shape: f32[1,128], index: 4, kind: input, shape index: {}]   ;;  %s2005_s5 = inlined_call_operand.vmem [shape: f32[1,128], index: 5, kind: input, shape index: {}]   ;;  %s2006_s6 = inlined_call_operand.hbm [shape: f32[16,32], index: 6, kind: output, shape index: {0}]   ;;  %s2007_s7 = inlined_call_operand.vmem [shape: f32[16,8], index: 7, kind: output, shape index: {1}]  }
   0x1   :  { %2013 = sst [smem:[#allocation18_spill]] %s2000_s0 }
   0x2   :  { %2014 = sst [smem:[#allocation19_spill]] %s2002_s2 }
   0x3   :  { %2015 = sst [smem:[#allocation20_spill]] %s2003_s3 }
   0x4   :  { %13 = vsyncpa [#allocation3], 0 }
   0x5   :  { %15 = vsyncpa [#allocation3 + $0x1], 0 }
   0x6   :  { %16 = vsyncpa [#allocation6], 0 }
   0x7   :  { %18 = vsyncpa [#allocation6 + $0x1], 0 }
   0x8   :  { %19 = vsyncpa [#allocation9], 0 }
   0x9   :  { %20 = vsyncpa [#allocation4], 0 }
   0xa   :  { %22 = vsyncpa [#allocation4 + $0x1], 0  ;;  %s1577_s24 = smov 0   ;;  %s1579_s25 = smov 0  }
   0xb   :  { %s1581_s26 = smov 0   ;;  %s1583_s27 = smov 0  }
   0xc LB: > { %2016 = sst [smem:[#allocation16_spill]] %s1519_s26  ;;  %s1598_s28 = sadd.s32 4294967295, %s1523_s27   ;;  %s1523_s27 = sphi %s1583_s27, %s2042_s27   ;;  %s1519_s26 = sphi %s1581_s26, %s2039_s26   ;;  %s1515_s25 = sphi %s1579_s25, %s2041_s25   ;;  %s1511_s24 = sphi %s1577_s24, %s2040_s24  }
   0xd   : > { %s1144_s29 = sadd.s32 4294967294, %s1523_s27   ;;  %p48_p0 = scmp.ne.s32.totalorder %s1515_s25, %s1511_s24 }
   0xe   : > { %p2008_p1 = scmp.eq.s32.totalorder %s1598_s28, 0  ;;  %p188_p3 = scmp.eq.s32.totalorder %s1144_s29, 1 }
   0xf   : > { %p1145_p5 = scmp.ge.s32.totalorder %s1523_s27, 1  ;;  %p221_p7 = scmp.lt.s32.totalorder %s1523_s27, 3 }
  0x10   : > { %p1607_p4 = por %p2008_p1, %p48_p0  ;;  %p1612_p6 = por %p188_p3, %p48_p0 }
  0x11   : > { %p1617_p8 = pnand %p1145_p5, %p221_p7  ;;  %s1525_s10 = smov [#allocation7]  }
  0x12   : > { %s2017_s30 = scalar_select %p1607_p4, 1, 0 }
  0x13   : > { %s2018_s8 = scalar_select %p1612_p6, 1, 0 }
  0x14   : > { %s2019_s9 = scalar_select %p1617_p8, 1, 0 }
  0x15   : > { %s233_s11 = sshll.u32 %s1525_s10, 4  ;;  %p1228_p9 = pneg %p1617_p8  ;;  %s1621_s11 = int_to_ptr.vmem [resolvable:$true] %s233_s11 }
  0x16   : > { %s1526_s13 = smov [#allocation8]   ;;  %s2021_s2 = sld [smem:[#allocation19_spill]] }
  0x17   : > { %p1628_p11 = pnand %p1228_p9, %p2008_p1  ;;  %s246_s14 = sshll.u32 %s1526_s13, 4  ;;  %s1632_s14 = int_to_ptr.vmem [resolvable:$true] %s246_s14 }
  0x19   : > { %p1331_p13 = pneg %p1628_p11 }
  0x1c   : > { %s1329_s17 = scalar_lea.hbm %s2021_s2, 256 }
  0x1d   : > { %p1330_p12 = scmp.ne.s32.totalorder %s2021_s2, %s1329_s17  ;;  %p1336_p5 = scmp.lt.u32.totalorder %s1329_s17, %s2021_s2 }
  0x1f   : > { %p1332_p0 = pnand %p1331_p13, %p1330_p12 }
  0x21   : > { %p1333_p3 = pneg %p1332_p0 }
  0x23   : > { %p1338_p7 = pnand %p1336_p5, %p1333_p3 }
  0x25   : > { %1341 = shalt.err (!%p1338_p7)
}
  0x26   : > { %s1342_s22 = scalar_lea.vmem %s1621_s11, 256  ;;  %p1350_p2 = scmp.lt.s32.totalorder %s1621_s11, %s1621_s11 }
  0x27   : > { %p1343_p9 = scmp.ne.s32.totalorder %s1621_s11, %s1342_s22  ;;  %p1351_p12 = scmp.lt.s32.totalorder %s1342_s22, %s1342_s22 }
  0x29   : > { %p1345_p10 = pnand %p1343_p9, %p1331_p13  ;;  %p1352_p0 = por %p1351_p12, %p1350_p2 }
  0x2b   : > { %p1346_p1 = pneg %p1345_p10 }
  0x2d   : > { %p1353_p6 = pnand %p1352_p0, %p1346_p1 }
  0x2f   : > { %1356 = shalt.err (!%p1353_p6)
}
  0x30   : > { %s1527_s23 = smov 64   ;;  %s1528_s29 = smov 4  }
  0x31   : > { %1231 = dma.hbm_to_vmem [thread:$0]  (!%p1628_p11), %s2021_s2, 256, %s1621_s11, [#allocation6], %s1527_s23, %s1527_s23, %s1528_s29  }
  0x32   : > { %s2022_s3 = sld [smem:[#allocation20_spill]] }
  0x38   : > { %s1357_s17 = scalar_lea.hbm %s2022_s3, 256 }
  0x39   : > { %p1358_p2 = scmp.ne.s32.totalorder %s2022_s3, %s1357_s17  ;;  %p1364_p10 = scmp.lt.u32.totalorder %s1357_s17, %s2022_s3 }
  0x3b   : > { %p1360_p1 = pnand %p1358_p2, %p1331_p13 }
  0x3d   : > { %p1361_p6 = pneg %p1360_p1 }
  0x3f   : > { %p1366_p3 = pnand %p1364_p10, %p1361_p6 }
  0x41   : > { %1369 = shalt.err (!%p1366_p3)
}
  0x42   : > { %s1370_s11 = scalar_lea.vmem %s1632_s14, 256  ;;  %p1378_p12 = scmp.lt.s32.totalorder %s1632_s14, %s1632_s14 }
  0x43   : > { %p1371_p5 = scmp.ne.s32.totalorder %s1632_s14, %s1370_s11  ;;  %p1379_p0 = scmp.lt.s32.totalorder %s1370_s11, %s1370_s11 }
  0x45   : > { %p1373_p7 = pnand %p1371_p5, %p1331_p13  ;;  %p1380_p2 = por %p1379_p0, %p1378_p12 }
  0x47   : > { %p1374_p9 = pneg %p1373_p7 }
  0x49   : > { %p1381_p1 = pnand %p1380_p2, %p1374_p9 }
  0x4b   : > { %1384 = shalt.err (!%p1381_p1)
}
  0x4c   : > { %1234 = dma.hbm_to_vmem [thread:$0]  (!%p1628_p11), %s2022_s3, 256, %s1632_s14, [#allocation9], %s1527_s23, %s1527_s23, %s1528_s29  }
  0x4d   : > { %s1687_s13 = sadd.s32 1, %s1523_s27   ;;  %s35_s12 = sadd.s32 1, %s1519_s26 }
  0x4e   : > { %s32_s15 = ssub.s32 %s1523_s27, %s1687_s13  ;;  %p42_p13 = scmp.ne.s32.totalorder %s1519_s26, %s1515_s25 }
  0x4f   : > { %p33_p6 = scmp.eq.s32.totalorder %s32_s15, 0  ;;  %p43_p10 = scmp.eq.s32.totalorder %s1523_s27, 0 }
  0x50   : > { %p2023_p3 = scmp.eq.s32.totalorder %s1598_s28, 1  ;;  %p1248_p7 = scmp.lt.s32.totalorder %s1523_s27, 2 }
  0x51   : > { %s1703_s17 = scalar_select %p33_p6, %s1519_s26, %s35_s12  }
  0x52   : > { %p1697_p5 = por %p2023_p3, %p42_p13  ;;  %p44_p9 = por %p43_p10, %p42_p13 }
  0x53   : > { %2025 = sst [smem:[#allocation17_spill]] %s1703_s17  ;;  %s1706_s18 = sand.u32 1, %s1519_s26  }
  0x54   : > { %s2024_s16 = scalar_select %p1697_p5, 1, 0 }
  0x55   : > { %s1149_s14 = sshll.u32 %s1706_s18, 6  ;;  %s1180_s23 = sshll.u32 %s1523_s27, 10 }
  0x56   : > { %s2026_s0 = sld [smem:[#allocation18_spill]]  ;;  %s270_s21 = scalar_lea.vmem [#allocation2], %s1149_s14 }
  0x57   : > { %s277_s11 = sshll.u32 %s270_s21, 4  ;;  %p1717_p11 = pnand %p1248_p7, %p44_p9  ;;  %s1715_s11 = int_to_ptr.vmem [resolvable:$true] %s277_s11 }
  0x58   : > { %s267_s12 = scalar_lea.sflag [#allocation3], %s1706_s18 }
  0x59   : > { %p1387_p0 = pneg %p1717_p11 }
  0x5c   : > { %s1713_s20 = scalar_lea.hbm %s2026_s0, %s1180_s23  ;;  %s1390_s29 = scalar_lea.hbm %s2026_s0, 2048 }
  0x5d   : > { %s1385_s15 = scalar_lea.hbm %s1713_s20, 1024  ;;  %p1391_p13 = scmp.lt.u32.totalorder %s1713_s20, %s2026_s0 }
  0x5e   : > { %p1386_p12 = scmp.ne.s32.totalorder %s1713_s20, %s1385_s15  ;;  %p1392_p6 = scmp.lt.u32.totalorder %s1390_s29, %s1385_s15 }
  0x5f   : > { %p1394_p3 = scmp.lt.u32.totalorder %s1385_s15, %s1713_s20 }
  0x60   : > { %p1388_p2 = pnand %p1387_p0, %p1386_p12  ;;  %p1393_p10 = por %p1392_p6, %p1391_p13 }
  0x62   : > { %p1389_p1 = pneg %p1388_p2  ;;  %p1395_p7 = por %p1394_p3, %p1393_p10 }
  0x64   : > { %p1396_p9 = pnand %p1395_p7, %p1389_p1 }
  0x66   : > { %1399 = shalt.err (!%p1396_p9)
}
  0x67   : > { %s1400_s10 = scalar_lea.vmem %s1715_s11, 1024  ;;  %s1529_s14 = smov [#allocation2]  }
  0x68   : > { %p1401_p12 = scmp.ne.s32.totalorder %s1715_s11, %s1400_s10  ;;  %s1405_s23 = sshll.u32 %s1529_s14, 4  ;;  %s1406_s23 = int_to_ptr.vmem [resolvable:$false] %s1405_s23 }
  0x69   : > { %s1407_s19 = scalar_lea.vmem %s1406_s23, 2048  ;;  %p1408_p4 = scmp.lt.s32.totalorder %s1715_s11, %s1406_s23 }
  0x6a   : > { %p1403_p2 = pnand %p1401_p12, %p1387_p0  ;;  %p1409_p13 = scmp.lt.s32.totalorder %s1407_s19, %s1400_s10 }
  0x6c   : > { %p1404_p5 = pneg %p1403_p2  ;;  %p1410_p6 = por %p1409_p13, %p1408_p4 }
  0x6e   : > { %p1411_p10 = pnand %p1410_p6, %p1404_p5 }
  0x70   : > { %1414 = shalt.err (!%p1411_p10)
}
  0x71   : > { %s1530_s15 = smov 128   ;;  %s1531_s29 = smov 8  }
  0x72   : > { %1238 = dma.hbm_to_vmem [thread:$0]  (!%p1717_p11), %s1713_s20, 1024, %s1715_s11, %s267_s12, %s1530_s15, %s1530_s15, %s1531_s29  }
  0x73   : > { %s1152_s21 = sshll.u32 %s1706_s18, 3  ;;  %s1153_s14 = sshll.u32 %s1523_s27, 7 }
  0x74   : > { %s1755_s19 = scalar_lea.hbm %s2001_s1, %s1153_s14  ;;  %s291_s0 = scalar_lea.vmem [#allocation5], %s1152_s21 }
  0x75   : > { %s298_s2 = sshll.u32 %s291_s0, 4  ;;  %s2028_s3 = sand.u32 1, %s1523_s27   ;;  %s299_s2 = int_to_ptr.vmem [resolvable:$true] %s298_s2 }
  0x76   : > { %s288_s17 = scalar_lea.sflag [#allocation6], %s2028_s3  ;;  %s1415_s26 = scalar_lea.hbm %s1755_s19, 128 }
  0x77   : > { %p1416_p4 = scmp.ne.s32.totalorder %s1755_s19, %s1415_s26  ;;  %s1420_s11 = scalar_lea.hbm %s2001_s1, 256 }
  0x78   : > { %p1421_p3 = scmp.lt.u32.totalorder %s1755_s19, %s2001_s1  ;;  %p1422_p7 = scmp.lt.u32.totalorder %s1420_s11, %s1415_s26 }
  0x79   : > { %p1418_p5 = pnand %p1416_p4, %p1387_p0  ;;  %p1424_p12 = scmp.lt.u32.totalorder %s1415_s26, %s1755_s19 }
  0x7a   : > { %p1423_p9 = por %p1422_p7, %p1421_p3 }
  0x7b   : > { %p1419_p1 = pneg %p1418_p5 }
  0x7c   : > { %p1425_p2 = por %p1424_p12, %p1423_p9 }
  0x7e   : > { %p1426_p13 = pnand %p1425_p2, %p1419_p1 }
  0x80   : > { %1429 = shalt.err (!%p1426_p13)
}
  0x81   : > { %s1430_s0 = scalar_lea.vmem %s299_s2, 128  ;;  %s1532_s3 = smov [#allocation5]  }
  0x82   : > { %p1431_p6 = scmp.ne.s32.totalorder %s299_s2, %s1430_s0  ;;  %s1435_s29 = sshll.u32 %s1532_s3, 4  ;;  %s1436_s29 = int_to_ptr.vmem [resolvable:$false] %s1435_s29 }
  0x83   : > { %s1437_s21 = scalar_lea.vmem %s1436_s29, 256  ;;  %p1438_p5 = scmp.lt.s32.totalorder %s299_s2, %s1436_s29 }
  0x84   : > { %p1433_p10 = pnand %p1431_p6, %p1387_p0  ;;  %p1439_p8 = scmp.lt.s32.totalorder %s1437_s21, %s1430_s0 }
  0x86   : > { %p1434_p4 = pneg %p1433_p10  ;;  %p1440_p3 = por %p1439_p8, %p1438_p5 }
  0x88   : > { %p1441_p7 = pnand %p1440_p3, %p1434_p4 }
  0x8a   : > { %1444 = shalt.err (!%p1441_p7)
}
  0x8b   : > { %1241 = dma.hbm_to_vmem [thread:$0]  (!%p1717_p11), %s1755_s19, 128, %s299_s2, %s288_s17  }
  0x8c   : > { %p2029_p1 = scmp.ne.s32.totalorder %s2019_s9, 0 }
  0x8d   : > { %s1781_s26 = sand.u32 (!%p2029_p1), 1, %s1515_s25   ;;  %p2030_p8 = scmp.ne.s32.totalorder (!%p2029_p1), %s2017_s30, 0 }
  0x8e   : > { %307 = sbr.rel (%p2029_p1) target bundleno = 635 (0x27b), region = 44  ;;  %s1155_s14 = sshll.u32 (!%p2029_p1), %s1781_s26, 6 }
  0x8f   : > { %s310_s23 = scalar_lea.sflag (!%p2029_p1), [#allocation3], %s1781_s26  ;;  %s1785_s10 = scalar_lea.vmem (!%p2029_p1), [#allocation2], %s1155_s14 }
  0x95   : > { %1490 = dma.done.wait (%p2030_p8), %s310_s23, 1024  }
  0x96   : > { %1492 = vsyncadd (%p2030_p8), %s310_s23, 4294966272  ;;  %s318_s2 = sand.u32 1, %s1598_s28   ;;  %s1156_s9 = sshll.u32 %s1781_s26, 3 }
  0x97   : > { %s319_s17 = scalar_lea.sflag [#allocation6], %s318_s2  ;;  %s322_s22 = scalar_lea.vmem [#allocation5], %s1156_s9 }
  0x98   : > { %1494 = dma.done.wait (%p2030_p8), %s319_s17, 128  }
  0x99   : > { %1496 = vsyncadd (%p2030_p8), %s319_s17, 4294967168  ;;  %p2031_p11 = scmp.eq.s32.totalorder %s1598_s28, 0 }
  0x9b   : > { %1498 = dma.done.wait (%p2031_p11), [#allocation6], 256   ;;  %p2032_p0 = pmov %p2031_p11 }
  0x9d   : > { %1500 = vsyncadd (%p2032_p0), [#allocation6], 4294967040  ;;  %p2033_p9 = pmov %p2032_p0 }
  0x9e   : > { %p2034_p12 = pmov %p2032_p0 }
  0x9f   : > { %1502 = dma.done.wait (%p2033_p9), [#allocation9], 256  }
  0xa0   : > { %1504 = vsyncadd (%p2034_p12), [#allocation9], 4294967040  ;;  %v1533_v0 = vmov 0.0   ;;  %vm1534_vm0 = vmmov 0   ;;  %v1293_v1 = vld [vmem:[#allocation7] sm:$0xff]   ;;  %v1294_v2 = vld [vmem:[#allocation8] sm:$0xff]   ;;  %v579_v19 = vlaneseq }
  0xa1   : > { %1206 = vmatprep.subr.bf16.mxu1 %v1533_v0  ;;  %1210 = vmatprep.mubr.msk.bf16.mxu1 %vm1534_vm0, %v1533_v0  ;;  %v1295_v3 = vld [vmem:[#allocation7 + $0x8] sm:$0xff]   ;;  %v1296_v4 = vld [vmem:[#allocation8 + $0x8] sm:$0xff]   ;;  %v1808_v5 = vld [vmem:[%s1785_s10] sm:$0xff]  ;;  %vm428_vm1 = vcmask 261120   ;;  %v1535_v23 = vmov 1966171168  }
  0xa2   : > { %1194 = vmatprep.subr.bf16.mxu0 %v1293_v1  ;;  %1207 = vmatpush3.bf16.msra.mxu1 %v1294_v2  ;;  %v1811_v6 = vld [vmem:[%s1785_s10 + $0x8] sm:$0xff]  ;;  %v1816_v9 = vld [vmem:[%s1785_s10 + $0x10] sm:$0xff]  ;;  %v1819_v10 = vld [vmem:[%s1785_s10 + $0x18] sm:$0xff]  ;;  %v580_v20 = vshrl.u32 %v579_v19, 7  ;;  %v944_v21 = vand.u32 127, %v579_v19  ;;  %v577_v24 = vunpack.c.l.s4 %v1535_v23  ;;  %vm919_vm2 = vcmask 1041409  }
  0xa3   : > { %1195 = vmatpush3.bf16.msra.mxu0 %v1293_v1  ;;  %1208 = vmatprep.subr.bf16.mxu1 %v1533_v0  ;;  %v506_v7 = vld [vmem:[%s322_s22] sm:$0xff]  ;;  %v1181_v8 = vpack.c.bf16 %v1811_v6, %v1808_v5  ;;  %v1182_v13 = vpack.c.bf16 %v1819_v10, %v1816_v9  ;;  %v1836_v16 = vld [vmem:[%s1785_s10 + $0x30] sm:$0xff]  ;;  %v1839_v17 = vld [vmem:[%s1785_s10 + $0x38] sm:$0xff]  ;;  %vm921_vm3 = vcmask 1042434   ;;  %vm923_vm4 = vcmask 1043459   ;;  %p371_p2 = scmp.lt.s32.totalorder %s1598_s28, 1 }
  0xa4   : > { %1196 = vmatprep.subr.bf16.mxu0 %v1295_v3  ;;  %v1822_v11 = vld [vmem:[%s1785_s10 + $0x20] sm:$0xff]  ;;  %v507_v12 = vpack.c.bf16 %v506_v7, %v506_v7  ;;  %v1827_v14 = vld [vmem:[%s1785_s10 + $0x28] sm:$0xff]  ;;  %v1184_v18 = vpack.c.bf16 %v1839_v17, %v1836_v16  ;;  %v1844_v22 = vsub.s32 %v944_v21, %v580_v20  ;;  %v578_v25 = vunpack.c.0.s8 %v577_v24  ;;  %s1177_s29 = sshll.u32 %s1598_s28, 7  ;;  %s363_s21 = scalar_lea.vmem [#allocation10], %s1156_s9 }
  0xa5   : > { %v1183_v15 = vpack.c.bf16 %v1827_v14, %v1822_v11  ;;  %1198 = vmatprep.mubr.msk.bf16.mxu0 %vm428_vm1, %v1181_v8  ;;  %v1171_v26 = vld [vmem:[%s2005_s5] ss:$0 sm:$0xff]  ;;  %v626_v37 = vsub.s32 0, %v580_v20  ;;  %vm925_vm5 = vcmask 1044484   ;;  %vm927_vm6 = vcmask 1045509   ;;  %s1924_s11 = scalar_select %p371_p2, %s1598_s28, 1 }
  0xa6   : > { %1209 = vmatpush3.bf16.msra.mxu1 %v1296_v4  ;;  %v581_v27 = vsub.s32 %v578_v25, %v580_v20  ;;  %v1175_v58 = vld [vmem:[%s2004_s4] ss:$0 sm:$0xff]  ;;  %vm929_vm7 = vcmask 1046534   ;;  %vm931_vm8 = vcmask 1047559   ;;  %vm985_vm9 = vcmask 64512   ;;  %s1005_s14 = sshll.u32 %s363_s21, 4  ;;  %s1954_s2 = scalar_lea.hbm %s2006_s6, %s1177_s29  ;;  %s1956_s14 = int_to_ptr.vmem [resolvable:$true] %s1005_s14 }
  0xa7   : > { %1197 = vmatpush3.bf16.msra.mxu0 %v1295_v3  ;;  %s1160_s12 = sshll.u32 %s1924_s11, 3  ;;  %s988_s28 = scalar_lea.sflag [#allocation4], %s1781_s26 }
  0xa8   : > { %s374_s3 = scalar_lea.vmem %s2007_s7, %s1160_s12  ;;  %s1445_s9 = scalar_lea.vmem %s1956_s14, 128 }
  0xa9   : > { %1211 = vmatmul.mubr.msk.bf16.vlgmr.msra.gmra.mrb[0].mxu1 %vm428_vm1, %v507_v12  ;;  %p1446_p13 = scmp.ne.s32.totalorder %s1956_s14, %s1445_s9  ;;  %p2035_p6 = scmp.ne.s32.totalorder %s2024_s16, 0 }
  0xaa   : > { %1199 = vmatmul.mubr.msk.bf16.vlgmr.msra.gmra.mrb[0].mxu0 %vm428_vm1, %v1182_v13  ;;  %s1536_s17 = smov [#allocation10]  }
  0xab   : > { %1202 = vmatprep.mubr.msk.bf16.mxu0 %vm428_vm1, %v1183_v15  ;;  %p1447_p10 = pnand %p1446_p13, %p2035_p6  ;;  %s1449_s22 = sshll.u32 %s1536_s17, 4  ;;  %s1450_s22 = int_to_ptr.vmem [resolvable:$false] %s1449_s22 }
  0xac   : > { %s1451_s30 = scalar_lea.vmem %s1450_s22, 256  ;;  %p1452_p5 = scmp.lt.s32.totalorder %s1956_s14, %s1450_s22 }
  0xad   : > { %p1448_p4 = pneg %p1447_p10  ;;  %p1453_p3 = scmp.lt.s32.totalorder %s1451_s30, %s1445_s9 }
  0xaf   : > { %p1454_p7 = por %p1453_p3, %p1452_p5 }
  0xb1   : > { %p1455_p1 = pnand %p1454_p7, %p1448_p4 }
  0xb2   : > { %1203 = vmatmul.mubr.msk.bf16.gmra.mrb[4].mxu0 %vm428_vm1, %v1184_v18 }
 0x17c   : > { %v568_v28 = vpop.f32.mrb[0].mxu1 }
 0x17d   : > { %v1200_v29 = vpop.f32.mrb[0].mxu0  ;;  %v569_v30 = vadd.f32 %v1171_v26, %v568_v28  ;;  %v1212_v31 = vpop.f32.mrb[1].mxu1 }
 0x17e   : > { %v475_v32 = vpop.f32.mrb[1].mxu0  ;;  %v571_v33 = vpop.f32.mrb[2].mxu1 }
 0x17f   : > { %v1201_v34 = vpop.f32.mrb[2].mxu0  ;;  %v575_v35 = vcombine.high %v569_v30, %v569_v30  ;;  %v582_v36 = vrot.slane %v569_v30, %v581_v27  ;;  %v1213_v38 = vpop.f32.mrb[3].mxu1 }
 0x180   : > { %v478_v39 = vpop.f32.mrb[3].mxu0 }
 0x181   : > { %v589_v40 = vrot.slane %v575_v35, %v581_v27  ;;  %v590_v41 = vcombine.high %v582_v36, %v582_v36  ;;  %v598_v42 = vrot.slane %v582_v36, %v581_v27 }
 0x183   : > { %v591_v43 = vcombine.high %v589_v40, %v589_v40  ;;  %v620_v44 = vcombine.high %v598_v42, %v598_v42  ;;  %v627_v45 = vrot.slane %v598_v42, %v626_v37  ;;  %v612_v46 = vrot.slane %v590_v41, %v581_v27 }
 0x184   : > { %v605_v48 = vrot.slane %v589_v40, %v581_v27 }
 0x185   : > { %v1204_v47 = vpop.f32.mrb[4].mxu0  ;;  %v635_v49 = vrot.slane %v620_v44, %v626_v37  ;;  %v664_v50 = vadd.f32 %v627_v45, %v475_v32  ;;  %v622_v51 = vcombine.high %v612_v46, %v612_v46  ;;  %v631_v52 = vrot.slane %v612_v46, %v626_v37 }
 0x186   : > { %v491_v53 = vpop.f32.mrb[5].mxu0  ;;  %v621_v54 = vcombine.high %v605_v48, %v605_v48  ;;  %v643_v55 = vrot.slane %v605_v48, %v626_v37  ;;  %v619_v57 = vrot.slane %v591_v43, %v581_v27 }
 0x187   : > { %v1205_v56 = vpop.f32.mrb[6].mxu0  ;;  %v666_v59 = vadd.f32 %v1200_v29, %v635_v49  ;;  %v672_v60 = vmax.f32 %v664_v50, 0.0  ;;  %v639_v61 = vrot.slane %v622_v51, %v626_v37  ;;  %v665_v62 = vadd.f32 %v631_v52, %v478_v39 }
 0x188   : > { %v494_v63 = vpop.f32.mrb[7].mxu0  ;;  %v651_v0 = vrot.slane %v621_v54, %v626_v37  ;;  %v668_v1 = vadd.f32 %v643_v55, %v491_v53  ;;  %v623_v2 = vcombine.high %v619_v57, %v619_v57  ;;  %v647_v3 = vrot.slane %v619_v57, %v626_v37 }
 0x189   : > { %v674_v4 = vmax.f32 %v666_v59, 0.0  ;;  %v667_v7 = vadd.f32 %v1201_v34, %v639_v61  ;;  %v673_v8 = vmax.f32 %v665_v62, 0.0  ;;  %v687_v12 = vmul.f32 %v1175_v58, %v672_v60 }
 0x18a   : > { %v670_v13 = vadd.f32 %v1204_v47, %v651_v0  ;;  %v655_v15 = vrot.slane %v623_v2, %v626_v37  ;;  %v669_v18 = vadd.f32 %v647_v3, %v494_v63  ;;  %v676_v23 = vmax.f32 %v668_v1, 0.0 }
 0x18b   : > { %v675_v19 = vmax.f32 %v667_v7, 0.0  ;;  %695 = vadd.xlane.f32.xlu0 %v687_v12  ;;  %v689_v20 = vmul.f32 %v1175_v58, %v674_v4  ;;  %v688_v24 = vmul.f32 %v1175_v58, %v673_v8 }
 0x18c   : > { %v671_v21 = vadd.f32 %v1205_v56, %v655_v15  ;;  %v677_v25 = vmax.f32 %v669_v18, 0.0  ;;  %v678_v27 = vmax.f32 %v670_v13, 0.0  ;;  %v691_v28 = vmul.f32 %v1175_v58, %v676_v23 }
 0x18d   : > { %699 = vadd.xlane.f32.xlu1 %v689_v20  ;;  %v690_v26 = vmul.f32 %v1175_v58, %v675_v19 }
 0x18e   : > { %v679_v29 = vmax.f32 %v671_v21, 0.0  ;;  %v692_v30 = vmul.f32 %v1175_v58, %v677_v25  ;;  %v693_v31 = vmul.f32 %v1175_v58, %v678_v27 }
 0x18f   : > { %697 = vadd.xlane.f32.xlu0 %v688_v24 }
 0x190   : > { %v694_v32 = vmul.f32 %v1175_v58, %v679_v29 }
 0x191   : > { %701 = vadd.xlane.f32.xlu1 %v690_v26 }
 0x193   : > { %703 = vadd.xlane.f32.xlu0 %v691_v28 }
 0x195   : > { %705 = vadd.xlane.f32.xlu1 %v692_v30 }
 0x197   : > { %707 = vadd.xlane.f32.xlu0 %v693_v31 }
 0x199   : > { %709 = vadd.xlane.f32.xlu1 %v694_v32 }
 0x218   : > { %v696_v33 = vpop.xlane.xlu0 %695 }
 0x219   : > { %v711_v34 = vrot.slane %v696_v33, 4 }
 0x21a   : > { %v700_v35 = vpop.xlane.xlu1 %699 }
 0x21b   : > { %v712_v36 = vmax.f32 %v696_v33, %v711_v34  ;;  %v723_v37 = vrot.slane %v700_v35, 4 }
 0x21c   : > { %v698_v38 = vpop.xlane.xlu0 %697 }
 0x21d   : > { %v713_v39 = vrot.slane %v712_v36, 2  ;;  %v724_v40 = vmax.f32 %v700_v35, %v723_v37  ;;  %v717_v41 = vrot.slane %v698_v38, 4 }
 0x21e   : > { %v702_v42 = vpop.xlane.xlu1 %701 }
 0x21f   : > { %v714_v43 = vmax.f32 %v712_v36, %v713_v39  ;;  %v725_v44 = vrot.slane %v724_v40, 2  ;;  %v718_v45 = vmax.f32 %v698_v38, %v717_v41  ;;  %v729_v46 = vrot.slane %v702_v42, 4 }
 0x220   : > { %v704_v47 = vpop.xlane.xlu0 %703 }
 0x221   : > { %v715_v48 = vrot.slane %v714_v43, 1  ;;  %v726_v49 = vmax.f32 %v724_v40, %v725_v44  ;;  %v719_v50 = vrot.slane %v718_v45, 2  ;;  %v730_v51 = vmax.f32 %v702_v42, %v729_v46 }
 0x222   : > { %v735_v52 = vrot.slane %v704_v47, 4  ;;  %v706_v53 = vpop.xlane.xlu1 %705 }
 0x223   : > { %v716_v54 = vmax.f32 %v714_v43, %v715_v48  ;;  %v727_v55 = vrot.slane %v726_v49, 1  ;;  %v720_v56 = vmax.f32 %v718_v45, %v719_v50  ;;  %v731_v57 = vrot.slane %v730_v51, 2 }
 0x224   : > { %v736_v58 = vmax.f32 %v704_v47, %v735_v52  ;;  %v741_v59 = vrot.slane %v706_v53, 4  ;;  %v708_v60 = vpop.xlane.xlu0 %707 }
 0x225   : > { %v759_v61 = vsub.f32 %v696_v33, %v716_v54  ;;  %v728_v62 = vmax.f32 %v726_v49, %v727_v55  ;;  %v721_v63 = vrot.slane %v720_v56, 1  ;;  %v732_v0 = vmax.f32 %v730_v51, %v731_v57 }
 0x226   : > { %v737_v1 = vrot.slane %v736_v58, 2  ;;  %v742_v2 = vmax.f32 %v706_v53, %v741_v59  ;;  %v747_v3 = vrot.slane %v708_v60, 4  ;;  %v710_v4 = vpop.xlane.xlu1 %709 }
 0x227   : > { %v767_v7 = vmul.f32 1.442695, %v759_v61  ;;  %v761_v8 = vsub.f32 %v700_v35, %v728_v62  ;;  %v722_v12 = vmax.f32 %v720_v56, %v721_v63  ;;  %v733_v13 = vrot.slane %v732_v0, 1 }
 0x228   : > { %v738_v15 = vmax.f32 %v736_v58, %v737_v1  ;;  %v743_v18 = vrot.slane %v742_v2, 2  ;;  %v748_v19 = vmax.f32 %v708_v60, %v747_v3  ;;  %v753_v20 = vrot.slane %v710_v4, 4 }
 0x229   : > { %1297 = vpow2.f32 %v767_v7  ;;  %v771_v21 = vmul.f32 1.442695, %v761_v8  ;;  %v760_v23 = vsub.f32 %v698_v38, %v722_v12  ;;  %v734_v24 = vmax.f32 %v732_v0, %v733_v13 }
 0x22a   : > { %v739_v25 = vrot.slane %v738_v15, 1  ;;  %v744_v26 = vmax.f32 %v742_v2, %v743_v18  ;;  %v749_v27 = vrot.slane %v748_v19, 2  ;;  %v754_v28 = vmax.f32 %v710_v4, %v753_v20 }
 0x22b   : > { %1299 = vpow2.f32 %v771_v21  ;;  %v769_v29 = vmul.f32 1.442695, %v760_v23  ;;  %v762_v30 = vsub.f32 %v702_v42, %v734_v24 }
 0x22c   : > { %v740_v31 = vmax.f32 %v738_v15, %v739_v25  ;;  %v745_v32 = vrot.slane %v744_v26, 1  ;;  %v750_v33 = vmax.f32 %v748_v19, %v749_v27  ;;  %v755_v34 = vrot.slane %v754_v28, 2 }
 0x22d   : > { %1301 = vpow2.f32 %v769_v29  ;;  %v773_v35 = vmul.f32 1.442695, %v762_v30 }
 0x22e   : > { %v763_v36 = vsub.f32 %v704_v47, %v740_v31  ;;  %v746_v37 = vmax.f32 %v744_v26, %v745_v32  ;;  %v751_v39 = vrot.slane %v750_v33, 1  ;;  %v756_v40 = vmax.f32 %v754_v28, %v755_v34 }
 0x22f   : > { %1303 = vpow2.f32 %v773_v35 }
 0x230   : > { %v775_v38 = vmul.f32 1.442695, %v763_v36  ;;  %v764_v41 = vsub.f32 %v706_v53, %v746_v37  ;;  %v752_v43 = vmax.f32 %v750_v33, %v751_v39  ;;  %v757_v44 = vrot.slane %v756_v40, 1 }
 0x232   : > { %1305 = vpow2.f32 %v775_v38  ;;  %v777_v45 = vmul.f32 1.442695, %v764_v41  ;;  %v765_v46 = vsub.f32 %v708_v60, %v752_v43  ;;  %v758_v48 = vmax.f32 %v756_v40, %v757_v44 }
 0x233   : > { %v1852_v42 = vpop.eup %1297 }
 0x234   : > { %v783_v49 = vrot.slane %v1852_v42, 4  ;;  %1307 = vpow2.f32 %v777_v45  ;;  %v779_v50 = vmul.f32 1.442695, %v765_v46  ;;  %v766_v51 = vsub.f32 %v710_v4, %v758_v48 }
 0x235   : > { %v1855_v47 = vpop.eup %1299 }
 0x236   : > { %v784_v52 = vadd.f32 %v1852_v42, %v783_v49  ;;  %v795_v54 = vrot.slane %v1855_v47, 4  ;;  %1309 = vpow2.f32 %v779_v50  ;;  %v781_v53 = vmul.f32 1.442695, %v766_v51 }
 0x237   : > { %v1859_v55 = vpop.eup %1301 }
 0x238   : > { %v785_v56 = vrot.slane %v784_v52, 2  ;;  %v796_v57 = vadd.f32 %v1855_v47, %v795_v54  ;;  %v789_v58 = vrot.slane %v1859_v55, 4  ;;  %1311 = vpow2.f32 %v781_v53 }
 0x239   : > { %v1863_v59 = vpop.eup %1303 }
 0x23a   : > { %v786_v60 = vadd.f32 %v785_v56, %v784_v52  ;;  %v797_v61 = vrot.slane %v796_v57, 2  ;;  %v790_v62 = vadd.f32 %v1859_v55, %v789_v58  ;;  %v801_v63 = vrot.slane %v1863_v59, 4 }
 0x23c   : > { %v1867_v0 = vpop.eup %1305  ;;  %v787_v1 = vrot.slane %v786_v60, 1  ;;  %v798_v2 = vadd.f32 %v797_v61, %v796_v57  ;;  %v791_v3 = vrot.slane %v790_v62, 2  ;;  %v802_v4 = vadd.f32 %v1863_v59, %v801_v63 }
 0x23d   : > { %v807_v7 = vrot.slane %v1867_v0, 4 }
 0x23e   : > { %v1871_v8 = vpop.eup %1307  ;;  %v788_v12 = vadd.f32 %v787_v1, %v786_v60  ;;  %v799_v13 = vrot.slane %v798_v2, 1  ;;  %v792_v15 = vadd.f32 %v791_v3, %v790_v62  ;;  %v803_v18 = vrot.slane %v802_v4, 2 }
 0x23f   : > { %v808_v19 = vadd.f32 %v1867_v0, %v807_v7  ;;  %v813_v20 = vrot.slane %v1871_v8, 4 }
 0x240   : > { %v1875_v21 = vpop.eup %1309  ;;  %1313 = vrcp.f32 %v788_v12  ;;  %v800_v23 = vadd.f32 %v799_v13, %v798_v2  ;;  %v793_v24 = vrot.slane %v792_v15, 1  ;;  %v804_v25 = vadd.f32 %v803_v18, %v802_v4 }
 0x241   : > { %v809_v26 = vrot.slane %v808_v19, 2  ;;  %v814_v27 = vadd.f32 %v1871_v8, %v813_v20  ;;  %v819_v28 = vrot.slane %v1875_v21, 4 }
 0x242   : > { %v1879_v29 = vpop.eup %1311  ;;  %1315 = vrcp.f32 %v800_v23  ;;  %v794_v30 = vadd.f32 %v793_v24, %v792_v15  ;;  %v805_v31 = vrot.slane %v804_v25, 1 }
 0x243   : > { %v810_v32 = vadd.f32 %v809_v26, %v808_v19  ;;  %v815_v33 = vrot.slane %v814_v27, 2  ;;  %v820_v34 = vadd.f32 %v1875_v21, %v819_v28  ;;  %v825_v35 = vrot.slane %v1879_v29, 4 }
 0x244   : > { %1317 = vrcp.f32 %v794_v30  ;;  %v806_v36 = vadd.f32 %v805_v31, %v804_v25 }
 0x245   : > { %v811_v37 = vrot.slane %v810_v32, 1  ;;  %v816_v39 = vadd.f32 %v815_v33, %v814_v27  ;;  %v821_v40 = vrot.slane %v820_v34, 2  ;;  %v826_v38 = vadd.f32 %v1879_v29, %v825_v35 }
 0x246   : > { %1319 = vrcp.f32 %v806_v36 }
 0x247   : > { %v812_v41 = vadd.f32 %v811_v37, %v810_v32  ;;  %v817_v43 = vrot.slane %v816_v39, 1  ;;  %v822_v44 = vadd.f32 %v821_v40, %v820_v34  ;;  %v827_v45 = vrot.slane %v826_v38, 2 }
 0x249   : > { %1321 = vrcp.f32 %v812_v41  ;;  %v818_v46 = vadd.f32 %v817_v43, %v816_v39  ;;  %v823_v48 = vrot.slane %v822_v44, 1  ;;  %v828_v49 = vadd.f32 %v827_v45, %v826_v38 }
 0x24a   : > { %v1314_v50 = vpop.eup %1313 }
 0x24b   : > { %v832_v51 = vmul.f32 %v1314_v50, %v1852_v42  ;;  %1323 = vrcp.f32 %v818_v46  ;;  %v824_v52 = vadd.f32 %v823_v48, %v822_v44  ;;  %v829_v54 = vrot.slane %v828_v49, 1 }
 0x24c   : > { %v1316_v53 = vpop.eup %1315 }
 0x24d   : > { %v847_v56 = vmul.f32 %v832_v51, %v1808_v5  ;;  %v836_v57 = vmul.f32 %v1316_v53, %v1855_v47  ;;  %1325 = vrcp.f32 %v824_v52  ;;  %v830_v60 = vadd.f32 %v829_v54, %v828_v49 }
 0x24e   : > { %v1318_v58 = vpop.eup %1317  ;;  %v948_v42 = vrot.slane %v832_v51, %v1844_v22 }
 0x24f   : > { %v849_v61 = vmul.f32 %v836_v57, %v1816_v9  ;;  %v834_v62 = vmul.f32 %v1318_v58, %v1859_v55  ;;  %v855_v63 = vsel %vm428_vm1, %v847_v56, 0.0  ;;  %1327 = vrcp.f32 %v830_v60 }
 0x250   : > { %v1320_v1 = vpop.eup %1319  ;;  %v856_v2 = vrot.slane %v855_v63, 4  ;;  %v956_v55 = vrot.slane %v836_v57, %v1844_v22 }
 0x251   : > { %v848_v5 = vmul.f32 %v834_v62, %v1811_v6  ;;  %v952_v47 = vrot.slane %v834_v62, %v1844_v22  ;;  %v838_v3 = vmul.f32 %v1320_v1, %v1863_v59  ;;  %v869_v4 = vsel %vm428_vm1, %v849_v61, 0.0 }
 0x252   : > { %v857_v9 = vadd.f32 %v856_v2, %v855_v63  ;;  %v870_v7 = vrot.slane %v869_v4, 4 }
 0x253   : > { %v1322_v12 = vpop.eup %1321  ;;  %v850_v13 = vmul.f32 %v838_v3, %v1819_v10  ;;  %v862_v15 = vsel %vm428_vm1, %v848_v5, 0.0  ;;  %v960_v18 = vrot.slane %v838_v3, %v1844_v22  ;;  %v977_v6 = vsel %vm919_vm2, %v952_v47, %v948_v42 }
 0x254   : > { %v1901_v19 = vmul.f32 %v1322_v12, %v1867_v0  ;;  %v858_v59 = vrot.slane %v857_v9, 2  ;;  %v863_v20 = vrot.slane %v862_v15, 4  ;;  %v871_v23 = vadd.f32 %v870_v7, %v869_v4 }
 0x255   : > { %v1324_v24 = vpop.eup %1323  ;;  %v876_v25 = vsel %vm428_vm1, %v850_v13, 0.0  ;;  %v978_v26 = vsel %vm921_vm3, %v956_v55, %v977_v6 }
 0x256   : > { %v1906_v10 = vmul.f32 %v1324_v24, %v1871_v8  ;;  %v851_v27 = vmul.f32 %v1901_v19, %v1822_v11  ;;  %v859_v28 = vadd.f32 %v858_v59, %v857_v9  ;;  %v864_v30 = vadd.f32 %v863_v20, %v862_v15 }
 0x257   : > { %v1326_v31 = vpop.eup %1325  ;;  %v872_v0 = vrot.slane %v871_v23, 2  ;;  %v877_v32 = vrot.slane %v876_v25, 4  ;;  %v964_v33 = vrot.slane %v1901_v19, %v1844_v22  ;;  %v979_v34 = vsel %vm923_vm4, %v960_v18, %v978_v26 }
 0x258   : > { %v844_v35 = vmul.f32 %v1326_v31, %v1875_v21  ;;  %v852_v11 = vmul.f32 %v1906_v10, %v1827_v14  ;;  %v860_v8 = vrot.slane %v859_v28, 1  ;;  %v865_v36 = vrot.slane %v864_v30, 2 }
 0x259   : > { %v873_v37 = vadd.f32 %v872_v0, %v871_v23  ;;  %v878_v39 = vadd.f32 %v877_v32, %v876_v25  ;;  %v883_v40 = vsel %vm428_vm1, %v851_v27, 0.0  ;;  %v968_v38 = vrot.slane %v1906_v10, %v1844_v22  ;;  %v1328_v41 = vpop.eup %1327 }
 0x25a   : > { %v853_v43 = vmul.f32 %v844_v35, %v1836_v16  ;;  %v861_v21 = vadd.f32 %v860_v8, %v859_v28  ;;  %v866_v44 = vadd.f32 %v865_v36, %v864_v30  ;;  %v884_v45 = vrot.slane %v883_v40, 4 }
 0x25b   : > { %v846_v14 = vmul.f32 %v1328_v41, %v1879_v29  ;;  %v874_v46 = vrot.slane %v873_v37, 1  ;;  %v879_v48 = vrot.slane %v878_v39, 2  ;;  %v890_v49 = vsel %vm428_vm1, %v852_v11, 0.0 }
 0x25c   : > { %v867_v50 = vrot.slane %v866_v44, 1  ;;  %v885_v51 = vadd.f32 %v884_v45, %v883_v40  ;;  %v891_v52 = vrot.slane %v890_v49, 4  ;;  %v897_v54 = vsel %vm428_vm1, %v853_v43, 0.0 }
 0x25d   : > { %v854_v16 = vmul.f32 %v846_v14, %v1839_v17  ;;  %v875_v53 = vadd.f32 %v874_v46, %v873_v37  ;;  %v880_v56 = vadd.f32 %v879_v48, %v878_v39  ;;  %v898_v57 = vrot.slane %v897_v54, 4 }
 0x25e   : > { %v868_v58 = vadd.f32 %v867_v50, %v866_v44  ;;  %v886_v60 = vrot.slane %v885_v51, 2  ;;  %v892_v61 = vadd.f32 %v891_v52, %v890_v49  ;;  %v972_v29 = vrot.slane %v844_v35, %v1844_v22 }
 0x25f   : > { %v881_v62 = vrot.slane %v880_v56, 1  ;;  %v899_v63 = vadd.f32 %v898_v57, %v897_v54  ;;  %v904_v1 = vsel %vm428_vm1, %v854_v16, 0.0  ;;  %v976_v42 = vrot.slane %v846_v14, %v1844_v22 }
 0x260   : > { %v887_v2 = vadd.f32 %v886_v60, %v885_v51  ;;  %v893_v5 = vrot.slane %v892_v61, 2  ;;  %v905_v47 = vrot.slane %v904_v1, 4  ;;  %v920_v17 = vsel %vm919_vm2, %v868_v58, %v861_v21 }
 0x261   : > { %v882_v3 = vadd.f32 %v881_v62, %v880_v56  ;;  %v900_v4 = vrot.slane %v899_v63, 2  ;;  %v922_v9 = vsel %vm921_vm3, %v875_v53, %v920_v17  ;;  %v980_v7 = vsel %vm925_vm5, %v964_v33, %v979_v34 }
 0x262   : > { %v888_v55 = vrot.slane %v887_v2, 1  ;;  %v894_v12 = vadd.f32 %v893_v5, %v892_v61  ;;  %v906_v13 = vadd.f32 %v905_v47, %v904_v1  ;;  %v981_v22 = vsel %vm927_vm6, %v968_v38, %v980_v7 }
 0x263   : > { %v901_v15 = vadd.f32 %v900_v4, %v899_v63  ;;  %v924_v18 = vsel %vm923_vm4, %v882_v3, %v922_v9  ;;  %v982_v6 = vsel %vm929_vm7, %v972_v29, %v981_v22 }
 0x264   : > { %v889_v19 = vadd.f32 %v888_v55, %v887_v2  ;;  %v895_v59 = vrot.slane %v894_v12, 1  ;;  %v907_v20 = vrot.slane %v906_v13, 2  ;;  %v983_v23 = vsel %vm931_vm8, %v976_v42, %v982_v6 }
 0x265   : > { %v902_v24 = vrot.slane %v901_v15, 1  ;;  %986 = vst.msk [vmem:[%s374_s3] sm:$0xff] %vm985_vm9, %v983_v23 }
 0x266   : > { %v896_v25 = vadd.f32 %v895_v59, %v894_v12  ;;  %v908_v26 = vadd.f32 %v907_v20, %v906_v13  ;;  %v926_v10 = vsel %vm925_vm5, %v889_v19, %v924_v18 }
 0x267   : > { %v903_v27 = vadd.f32 %v902_v24, %v901_v15 }
 0x268   : > { %v909_v28 = vrot.slane %v908_v26, 1  ;;  %v928_v30 = vsel %vm927_vm6, %v896_v25, %v926_v10 }
 0x269   : > { %v930_v31 = vsel %vm929_vm7, %v903_v27, %v928_v30 }
 0x26a   : > { %v910_v0 = vadd.f32 %v909_v28, %v908_v26 }
 0x26c   : > { %v932_v32 = vsel %vm931_vm8, %v910_v0, %v930_v31 }
 0x26d   : > { %934 = vst.msk [vmem:[%s363_s21] sm:$0xff] %vm428_vm1, %v932_v32 }
 0x26e   : > { %1458 = shalt.err (!%p1455_p1)
}
 0x26f   : > { %s1459_s26 = scalar_lea.hbm %s1954_s2, 128  ;;  %s1463_s20 = scalar_lea.hbm %s2006_s6, 256 }
 0x270   : > { %p1460_p8 = scmp.ne.s32.totalorder %s1954_s2, %s1459_s26  ;;  %p1464_p9 = scmp.lt.u32.totalorder %s1954_s2, %s2006_s6 }
 0x271   : > { %p1465_p12 = scmp.lt.u32.totalorder %s1463_s20, %s1459_s26  ;;  %p1467_p13 = scmp.lt.u32.totalorder %s1459_s26, %s1954_s2 }
 0x272   : > { %p1461_p11 = pnand %p1460_p8, %p2035_p6 }
 0x273   : > { %p1466_p2 = por %p1465_p12, %p1464_p9 }
 0x274   : > { %p1462_p0 = pneg %p1461_p11 }
 0x275   : > { %p1468_p10 = por %p1467_p13, %p1466_p2 }
 0x277   : > { %p1469_p4 = pnand %p1468_p10, %p1462_p0 }
 0x279   : > { %1472 = shalt.err (!%p1469_p4)
}
 0x27a   : > { %1226 = dma.vmem_to_hbm [thread:$0]  (%p2035_p6), %s1956_s14, 128, %s1954_s2, %s988_s28  }
 0x27b PF: > { %s1020_s15 = sand.u32 1, %s1511_s24   ;;  %p2036_p5 = scmp.ne.s32.totalorder %s2018_s8, 0 }
 0x27c   : > { %p2037_p3 = scmp.ge.s32.totalorder %s1523_s27, 2  ;;  %s1021_s0 = scalar_lea.sflag [#allocation4], %s1020_s15 }
 0x27e   : > { %p1243_p7 = pnand %p2037_p3, %p2036_p5 }
 0x280   : > { %1506 = dma.done.wait (!%p1243_p7), %s1021_s0, 128  }
 0x281   : > { %1508 = vsyncadd (!%p1243_p7), %s1021_s0, 4294967168  ;;  %s2038_s3 = sld [smem:[#allocation16_spill]]  ;;  %s2039_s26 = sld [smem:[#allocation17_spill]] }
 0x282   : > { %p25_p1 = scmp.ge.s32.totalorder %s1687_s13, 4   ;;  %s2040_s24 = smov %s1515_s25 }
 0x283   : > { %s2042_s27 = smov %s1687_s13 }
 0x284   :  { %27 = sbr.rel (!%p25_p1) target bundleno = 12 (0xc), region = 122 }
 0x287   : > { %s2041_s25 = smov %s2038_s3 }
 0x28b   :  { %1033 = vsyncpa [#allocation3], 1 }
 0x28c   :  { %1035 = vsyncpa [#allocation3 + $0x1], 1 }
 0x28d   :  { %1036 = vsyncpa [#allocation6], 1 }
 0x28e   :  { %1038 = vsyncpa [#allocation6 + $0x1], 1 }
 0x28f   :  { %1039 = vsyncpa [#allocation9], 1 }
 0x290   :  { %1040 = vsyncpa [#allocation4], 1 }
 0x291   :  { %1042 = vsyncpa [#allocation4 + $0x1], 1 }

</bundles_post_ra>
